<compile_context>
chip_gen: v6e
topology: v6e:2x2x1
jax: 0.10.0
libtpu: 0.0.40
codegen_flags: <defaults>
</compile_context>

<pallas_src>
import math

import jax
import jax.numpy as jnp
import numpy as np
from jax.experimental import pallas as pl
from jax.experimental.pallas import tpu as pltpu


# ---------------------------------------------------------------------------
# Pallas kernel: ONE invocation == new_sequence() + T x forward().
# ---------------------------------------------------------------------------
def _lstm_controller_kernel(x_ref, wx_ref, b_ref, wrec_ref, out_ref,
                            xp_sc, rec_sc, st_sc):
    """x_ref:    (T*B, In)     all timesteps, batch-major within a step
       wx_ref:   (In, L*4H)    input->gates weights for all layers
       b_ref:    (1, L*4H)     biases (forget-gate entries = 1)
       wrec_ref: (L, 2H, 4H)   recurrent weights, rows = [W_prev | W_out]
       out_ref:  (T, B, 2*L*H) per step: [out_0..out_{L-1} | state_0..state_{L-1}]
       xp_sc:    (T*B, L*4H)   projected inputs (phase-1 result)
       rec_sc:   (B, (L+1)*H)  [zero_H | out_0 | ... | out_{L-1}]
       st_sc:    (B, L*H)      [state_0 | ... | state_{L-1}]"""
    T, B, _ = out_ref.shape
    L, H2, _ = wrec_ref.shape
    H = H2 // 2

    # ---- Phase 1: hoisted input projection for every (timestep, batch) row,
    # bias folded in once (M = T*B, K = In, N = L*4H). -----------------------
    xp_sc[...] = jnp.dot(x_ref[...], wx_ref[...],
                         preferred_element_type=jnp.float32) + b_ref[...]

    # ---- new_sequence(): zero recurrent state. Block 0 of rec_sc is the
    # "previous layer output" of layer 0 and stays zero forever. -------------
    rec_sc[...] = jnp.zeros_like(rec_sc)
    st_sc[...] = jnp.zeros_like(st_sc)

    # Recurrent weights are tiny; load them once outside the time loop.
    w_rec = [wrec_ref[i] for i in range(L)]

    # ---- Phase 2: serial recurrence over time, fully inside the kernel. ----
    def step(t, carry):
        row = pl.multiple_of(t * B, B)
        xp_t = xp_sc[pl.ds(row, B), :]                       # (B, L*4H)
        for i in range(L):                                   # static layer unroll
            # [out_{i-1} (this step) | out_i (previous step)] as ONE contiguous slice.
            rec_in = rec_sc[:, i * H:(i + 2) * H]            # (B, 2H)
            d = xp_t[:, i * 4 * H:(i + 1) * 4 * H] + jnp.dot(
                rec_in, w_rec[i], preferred_element_type=jnp.float32)
            # Gate layout identical to the torch module:
            #   d[:, :3H] -> sigmoid -> (forget, input, output); d[:, 3H:] -> tanh.
            g = jax.nn.sigmoid(d[:, :3 * H])                 # one EUP pass for all gates
            cand = jnp.tanh(d[:, 3 * H:])
            new_state = st_sc[:, i * H:(i + 1) * H] * g[:, :H] + g[:, H:2 * H] * cand
            new_out = g[:, 2 * H:] * jnp.tanh(new_state)
            st_sc[:, i * H:(i + 1) * H] = new_state
            rec_sc[:, (i + 1) * H:(i + 2) * H] = new_out
            # Write history directly into the lane-dense output slab
            # (no per-step concatenate).
            out_ref[t, :, i * H:(i + 1) * H] = new_out
            out_ref[t, :, (L + i) * H:(L + i + 1) * H] = new_state
        return carry

    jax.lax.fori_loop(0, T, step, 0, unroll=True)


# ---------------------------------------------------------------------------
# Wrapper: whole-sequence forward (== new_sequence(); T x forward()).
# ---------------------------------------------------------------------------
def lstm_controller_forward(x_seq, W_x, W_rec, b):
    T, B, In = x_seq.shape
    L, H2, H4 = W_rec.shape
    H = H2 // 2
    L4H = W_x.shape[1]
    assert L4H == L * 4 * H and H4 == 4 * H

    # Pad batch (sublane dim) up to a multiple of 8; rows are independent.
    B_pad = ((B + 7) // 8) * 8
    if B_pad != B:
        x_seq = jnp.pad(x_seq, ((0, 0), (0, B_pad - B), (0, 0)))
    x2d = x_seq.reshape(T * B_pad, In)

    slab = pl.pallas_call(
        _lstm_controller_kernel,
        out_shape=jax.ShapeDtypeStruct((T, B_pad, 2 * L * H), jnp.float32),
        grid_spec=pltpu.PrefetchScalarGridSpec(
            num_scalar_prefetch=0,
            grid=(1,),                       # whole sequence in one invocation
            in_specs=[
                pl.BlockSpec((T * B_pad, In), lambda g: (0, 0)),
                pl.BlockSpec((In, L4H), lambda g: (0, 0)),
                pl.BlockSpec((1, L4H), lambda g: (0, 0)),
                pl.BlockSpec((L, 2 * H, 4 * H), lambda g: (0, 0, 0)),
            ],
            out_specs=pl.BlockSpec((T, B_pad, 2 * L * H), lambda g: (0, 0, 0)),
            scratch_shapes=[
                pltpu.VMEM((T * B_pad, L4H), jnp.float32),      # projected inputs
                pltpu.VMEM((B_pad, (L + 1) * H), jnp.float32),  # [0 | out_0..out_{L-1}]
                pltpu.VMEM((B_pad, L * H), jnp.float32),        # [state_0..state_{L-1}]
            ],
        ),
        # Time recurrence is internal to the single (serial) grid step.
        compiler_params=pltpu.CompilerParams(
            dimension_semantics=("arbitrary",)),
    )(x2d, W_x, b.reshape(1, L4H), W_rec)

    slab = slab[:, :B, :]
    outputs_cat = slab[..., :L * H]   # torch.cat(self.outputs, -1) per timestep
    states_cat = slab[..., L * H:]    # per-layer cell states, concatenated
    return outputs_cat, states_cat


# ---------------------------------------------------------------------------
# Deterministic parameter construction (mirrors init()/reset_parameters()) in
# the split layout:  W_x (In, L*4H),  W_rec (L, 2H, 4H) rows=[W_prev|W_out],
# b (L*4H,) with forget-gate entries = 1.
# ---------------------------------------------------------------------------
def make_params(key, input_size, layer_sizes):
    L = len(layer_sizes)
    H = layer_sizes[0]
    assert all(s == H for s in layer_sizes), "example uses equal layer sizes"
    gain_tanh = 5.0 / 3.0

    W_x = np.zeros((input_size, L * 4 * H), np.float32)
    W_rec = np.zeros((L, 2 * H, 4 * H), np.float32)
    b = np.zeros((L * 4 * H,), np.float32)

    keys = jax.random.split(key, 6 * L)
    kidx = 0

    def uni(shape, lim):
        nonlocal kidx
        k = keys[kidx]
        kidx += 1
        return np.asarray(jax.random.uniform(k, shape, jnp.float32, -lim, lim))

    for i in range(L):
        in_sz = (layer_sizes[i - 1] if i > 0 else 0) + layer_sizes[i] + input_size
        stdev = math.sqrt(2.0 / (layer_sizes[i] + in_sz))
        a = math.sqrt(3.0) * stdev
        c = i * 4 * H
        # in_to_all[i]: gate columns use a, candidate columns use a*gain(tanh)
        W_x[:, c:c + 3 * H] = uni((input_size, 3 * H), a)
        W_x[:, c + 3 * H:c + 4 * H] = uni((input_size, H), a * gain_tanh)
        # prev_to_all[i-1] rows (layer 0 has no prev layer; rows stay zero and
        # the corresponding recurrent block is the permanent zero block).
        if i > 0:
            W_rec[i, :H, :3 * H] = uni((H, 3 * H), a)
            W_rec[i, :H, 3 * H:] = uni((H, H), a * gain_tanh)
        # out_to_all[i] rows
        W_rec[i, H:, :3 * H] = uni((H, 3 * H), a)
        W_rec[i, H:, 3 * H:] = uni((H, H), a * gain_tanh)
        # bias: first H entries (forget gate) = 1, rest = 0
        b[c:c + H] = 1.0

    return jnp.asarray(W_x), jnp.asarray(W_rec), jnp.asarray(b)


# ---------------------------------------------------------------------------
# Pure-JAX reference of the torch forward() called T times, for verification.
# ---------------------------------------------------------------------------
def reference_forward(x_seq, W_x, W_rec, b):
    T, B, _ = x_seq.shape
    L, H2, _ = W_rec.shape
    H = H2 // 2
    outs = [jnp.zeros((B, H), jnp.float32) for _ in range(L)]
    states = [jnp.zeros((B, H), jnp.float32) for _ in range(L)]
    out_hist, st_hist = [], []
    for t in range(T):
        x = x_seq[t]
        prev = jnp.zeros((B, H), jnp.float32)
        for i in range(L):
            d = x @ W_x[:, i * 4 * H:(i + 1) * 4 * H] + b[i * 4 * H:(i + 1) * 4 * H]
            d = d + jnp.concatenate([prev, outs[i]], axis=-1) @ W_rec[i]
            fg = jax.nn.sigmoid(d[:, :H])
            ig = jax.nn.sigmoid(d[:, H:2 * H])
            og = jax.nn.sigmoid(d[:, 2 * H:3 * H])
            cand = jnp.tanh(d[:, 3 * H:])
            states[i] = states[i] * fg + ig * cand
            outs[i] = og * jnp.tanh(states[i])
            prev = outs[i]
        out_hist.append(jnp.concatenate(outs, axis=-1))
        st_hist.append(jnp.concatenate(states, axis=-1))
    return jnp.stack(out_hist), jnp.stack(st_hist)


if __name__ == "__main__":
    T = 8                   # timesteps (forward() calls after new_sequence())
    B = 2                   # batch
    input_size = 16         # controller input width
    layer_sizes = [32, 32]
    L, H = len(layer_sizes), layer_sizes[0]

    key = jax.random.PRNGKey(0)
    k_par, k_x = jax.random.split(key)
    W_x, W_rec, b = make_params(k_par, input_size, layer_sizes)
    x_seq = jax.random.normal(k_x, (T, B, input_size), jnp.float32)

    outs, states = lstm_controller_forward(x_seq, W_x, W_rec, b)
    jax.block_until_ready(outs)

    r_outs, r_states = reference_forward(x_seq, W_x, W_rec, b)

    assert outs.shape == (T, B, sum(layer_sizes))
    np.testing.assert_allclose(np.asarray(outs), np.asarray(r_outs),
                               rtol=1e-5, atol=1e-5)
    np.testing.assert_allclose(np.asarray(states), np.asarray(r_states),
                               rtol=1e-5, atol=1e-5)
    print("KERNEL_OK")
</pallas_src>

<mosaic_0001>
module attributes {stable_mosaic.version = 11 : i64} {
  func.func @_lstm_controller_kernel(%arg0: i32, %arg1: memref<64x16xf32, #tpu.memory_space<vmem>>, %arg2: memref<16x256xf32, #tpu.memory_space<vmem>>, %arg3: memref<1x256xf32, #tpu.memory_space<vmem>>, %arg4: memref<2x64x128xf32, #tpu.memory_space<vmem>>, %arg5: memref<8x8x128xf32, #tpu.memory_space<vmem>>, %arg6: memref<64x256xf32, #tpu.memory_space<vmem>>, %arg7: memref<8x96xf32, #tpu.memory_space<vmem>>, %arg8: memref<8x64xf32, #tpu.memory_space<vmem>>) attributes {dimension_semantics = [#tpu.dimension_semantics<arbitrary>], iteration_bounds = array<i64: 1>, scalar_prefetch = 0 : i64, scratch_operands = 3 : i64, tpu.core_type = #tpu.core_type<tc>, window_params = [{pipeline_mode = #tpu.pipeline_mode<synchronous>, transform_indices = @transform_0, window_bounds = array<i64: 64, 16>}, {pipeline_mode = #tpu.pipeline_mode<synchronous>, transform_indices = @transform_1, window_bounds = array<i64: 16, 256>}, {pipeline_mode = #tpu.pipeline_mode<synchronous>, transform_indices = @transform_2, window_bounds = array<i64: 1, 256>}, {pipeline_mode = #tpu.pipeline_mode<synchronous>, transform_indices = @transform_3, window_bounds = array<i64: 2, 64, 128>}, {pipeline_mode = #tpu.pipeline_mode<synchronous>, transform_indices = @transform_4, window_bounds = array<i64: 8, 8, 128>}]} {
    %c0 = arith.constant 0 : index
    %c0_0 = arith.constant 0 : index
    %0 = vector.load %arg1[%c0, %c0_0] : memref<64x16xf32, #tpu.memory_space<vmem>>, vector<64x16xf32>
    %c0_1 = arith.constant 0 : index
    %c0_2 = arith.constant 0 : index
    %1 = vector.load %arg2[%c0_1, %c0_2] : memref<16x256xf32, #tpu.memory_space<vmem>>, vector<16x256xf32>
    %cst = arith.constant dense<0.000000e+00> : vector<64x256xf32>
    %2 = tpu.matmul %0, %1, %cst {dimension_numbers = #tpu.dot_dimension_numbers<[1], [0], [0], [1], [0, 0, 1, 1], [], []>} : vector<64x16xf32>, vector<16x256xf32>, vector<64x256xf32> -> vector<64x256xf32>
    %c0_3 = arith.constant 0 : index
    %c0_4 = arith.constant 0 : index
    %3 = vector.load %arg3[%c0_3, %c0_4] : memref<1x256xf32, #tpu.memory_space<vmem>>, vector<1x256xf32>
    %4 = vector.broadcast %3 : vector<1x256xf32> to vector<64x256xf32>
    %5 = arith.addf %2, %4 : vector<64x256xf32>
    %c0_5 = arith.constant 0 : index
    %c0_6 = arith.constant 0 : index
    %6 = vector.load %arg6[%c0_5, %c0_6] : memref<64x256xf32, #tpu.memory_space<vmem>>, vector<64x256xf32>
    tpu.vector_store %arg6[%c0_5, %c0_6], %5 {strides = array<i32>} : memref<64x256xf32, #tpu.memory_space<vmem>>, vector<64x256xf32>,
    %cst_7 = arith.constant 0.000000e+00 : f32
    %7 = vector.broadcast %cst_7 : f32 to vector<8x96xf32>
    %c0_8 = arith.constant 0 : index
    %c0_9 = arith.constant 0 : index
    %8 = vector.load %arg7[%c0_8, %c0_9] : memref<8x96xf32, #tpu.memory_space<vmem>>, vector<8x96xf32>
    tpu.vector_store %arg7[%c0_8, %c0_9], %7 {strides = array<i32>} : memref<8x96xf32, #tpu.memory_space<vmem>>, vector<8x96xf32>,
    %cst_10 = arith.constant 0.000000e+00 : f32
    %9 = vector.broadcast %cst_10 : f32 to vector<8x64xf32>
    %c0_11 = arith.constant 0 : index
    %c0_12 = arith.constant 0 : index
    %10 = vector.load %arg8[%c0_11, %c0_12] : memref<8x64xf32, #tpu.memory_space<vmem>>, vector<8x64xf32>
    tpu.vector_store %arg8[%c0_11, %c0_12], %9 {strides = array<i32>} : memref<8x64xf32, #tpu.memory_space<vmem>>, vector<8x64xf32>,
    %c0_13 = arith.constant 0 : index
    %c0_14 = arith.constant 0 : index
    %c0_15 = arith.constant 0 : index
    %11 = vector.load %arg4[%c0_13, %c0_14, %c0_15] : memref<2x64x128xf32, #tpu.memory_space<vmem>>, vector<1x64x128xf32>
    %12 = vector.shape_cast %11 : vector<1x64x128xf32> to vector<64x128xf32>
    %c1 = arith.constant 1 : index
    %c0_16 = arith.constant 0 : index
    %c0_17 = arith.constant 0 : index
    %13 = vector.load %arg4[%c1, %c0_16, %c0_17] : memref<2x64x128xf32, #tpu.memory_space<vmem>>, vector<1x64x128xf32>
    %14 = vector.shape_cast %13 : vector<1x64x128xf32> to vector<64x128xf32>
    %c0_i32 = arith.constant 0 : i32
    %c8_i32 = arith.constant 8 : i32
    %15 = arith.muli %c0_i32, %c8_i32 : i32
    %16 = tpu.assume_multiple %15, 8 : i32
    %17 = arith.index_cast %16 : i32 to index
    %c0_18 = arith.constant 0 : index
    %18 = vector.load %arg6[%17, %c0_18] : memref<64x256xf32, #tpu.memory_space<vmem>>, vector<8x256xf32>
    %c0_19 = arith.constant 0 : index
    %c0_20 = arith.constant 0 : index
    %19 = vector.load %arg7[%c0_19, %c0_20] : memref<8x96xf32, #tpu.memory_space<vmem>>, vector<8x64xf32>
    %20 = vector.extract_strided_slice %18 {offsets = [0, 0], sizes = [8, 128], strides = [1, 1]} : vector<8x256xf32> to vector<8x128xf32>
    %cst_21 = arith.constant dense<0.000000e+00> : vector<8x128xf32>
    %21 = tpu.matmul %19, %12, %cst_21 {dimension_numbers = #tpu.dot_dimension_numbers<[1], [0], [0], [1], [0, 0, 1, 1], [], []>} : vector<8x64xf32>, vector<64x128xf32>, vector<8x128xf32> -> vector<8x128xf32>
    %22 = arith.addf %20, %21 : vector<8x128xf32>
    %23 = vector.extract_strided_slice %22 {offsets = [0, 0], sizes = [8, 96], strides = [1, 1]} : vector<8x128xf32> to vector<8x96xf32>
    %24 = arith.negf %23 : vector<8x96xf32>
    %25 = math.exp %24 : vector<8x96xf32>
    %cst_22 = arith.constant 1.000000e+00 : f32
    %26 = vector.broadcast %cst_22 : f32 to vector<8x96xf32>
    %27 = arith.addf %26, %25 : vector<8x96xf32>
    %28 = arith.divf %26, %27 : vector<8x96xf32>
    %29 = vector.extract_strided_slice %22 {offsets = [0, 96], sizes = [8, 32], strides = [1, 1]} : vector<8x128xf32> to vector<8x32xf32>
    %30 = math.tanh %29 : vector<8x32xf32>
    %c0_23 = arith.constant 0 : index
    %c0_24 = arith.constant 0 : index
    %31 = vector.load %arg8[%c0_23, %c0_24] : memref<8x64xf32, #tpu.memory_space<vmem>>, vector<8x32xf32>
    %32 = vector.extract_strided_slice %28 {offsets = [0, 0], sizes = [8, 32], strides = [1, 1]} : vector<8x96xf32> to vector<8x32xf32>
    %33 = arith.mulf %31, %32 : vector<8x32xf32>
    %34 = vector.extract_strided_slice %28 {offsets = [0, 32], sizes = [8, 32], strides = [1, 1]} : vector<8x96xf32> to vector<8x32xf32>
    %35 = arith.mulf %34, %30 : vector<8x32xf32>
    %36 = arith.addf %33, %35 : vector<8x32xf32>
    %37 = vector.extract_strided_slice %28 {offsets = [0, 64], sizes = [8, 32], strides = [1, 1]} : vector<8x96xf32> to vector<8x32xf32>
    %38 = math.tanh %36 : vector<8x32xf32>
    %39 = arith.mulf %37, %38 : vector<8x32xf32>
    %c0_25 = arith.constant 0 : index
    %c0_26 = arith.constant 0 : index
    %40 = vector.load %arg8[%c0_25, %c0_26] : memref<8x64xf32, #tpu.memory_space<vmem>>, vector<8x32xf32>
    tpu.vector_store %arg8[%c0_25, %c0_26], %36 {strides = array<i32>} : memref<8x64xf32, #tpu.memory_space<vmem>>, vector<8x32xf32>,
    %c0_27 = arith.constant 0 : index
    %c32 = arith.constant 32 : index
    %41 = vector.load %arg7[%c0_27, %c32] : memref<8x96xf32, #tpu.memory_space<vmem>>, vector<8x32xf32>
    tpu.vector_store %arg7[%c0_27, %c32], %39 {strides = array<i32>} : memref<8x96xf32, #tpu.memory_space<vmem>>, vector<8x32xf32>,
    %42 = arith.index_cast %c0_i32 : i32 to index
    %c0_28 = arith.constant 0 : index
    %c0_29 = arith.constant 0 : index
    %43 = vector.load %arg5[%42, %c0_28, %c0_29] : memref<8x8x128xf32, #tpu.memory_space<vmem>>, vector<1x8x32xf32>
    %44 = vector.shape_cast %43 : vector<1x8x32xf32> to vector<8x32xf32>
    %45 = vector.shape_cast %39 : vector<8x32xf32> to vector<1x8x32xf32>
    tpu.vector_store %arg5[%42, %c0_28, %c0_29], %45 {strides = array<i32>} : memref<8x8x128xf32, #tpu.memory_space<vmem>>, vector<1x8x32xf32>,
    %46 = arith.index_cast %c0_i32 : i32 to index
    %c0_30 = arith.constant 0 : index
    %c64 = arith.constant 64 : index
    %47 = vector.load %arg5[%46, %c0_30, %c64] : memref<8x8x128xf32, #tpu.memory_space<vmem>>, vector<1x8x32xf32>
    %48 = vector.shape_cast %47 : vector<1x8x32xf32> to vector<8x32xf32>
    %49 = vector.shape_cast %36 : vector<8x32xf32> to vector<1x8x32xf32>
    tpu.vector_store %arg5[%46, %c0_30, %c64], %49 {strides = array<i32>} : memref<8x8x128xf32, #tpu.memory_space<vmem>>, vector<1x8x32xf32>,
    %c0_31 = arith.constant 0 : index
    %c32_32 = arith.constant 32 : index
    %50 = vector.load %arg7[%c0_31, %c32_32] : memref<8x96xf32, #tpu.memory_space<vmem>>, vector<8x64xf32>
    %51 = vector.extract_strided_slice %18 {offsets = [0, 128], sizes = [8, 128], strides = [1, 1]} : vector<8x256xf32> to vector<8x128xf32>
    %cst_33 = arith.constant dense<0.000000e+00> : vector<8x128xf32>
    %52 = tpu.matmul %50, %14, %cst_33 {dimension_numbers = #tpu.dot_dimension_numbers<[1], [0], [0], [1], [0, 0, 1, 1], [], []>} : vector<8x64xf32>, vector<64x128xf32>, vector<8x128xf32> -> vector<8x128xf32>
    %53 = arith.addf %51, %52 : vector<8x128xf32>
    %54 = vector.extract_strided_slice %53 {offsets = [0, 0], sizes = [8, 96], strides = [1, 1]} : vector<8x128xf32> to vector<8x96xf32>
    %55 = arith.negf %54 : vector<8x96xf32>
    %56 = math.exp %55 : vector<8x96xf32>
    %cst_34 = arith.constant 1.000000e+00 : f32
    %57 = vector.broadcast %cst_34 : f32 to vector<8x96xf32>
    %58 = arith.addf %57, %56 : vector<8x96xf32>
    %59 = arith.divf %57, %58 : vector<8x96xf32>
    %60 = vector.extract_strided_slice %53 {offsets = [0, 96], sizes = [8, 32], strides = [1, 1]} : vector<8x128xf32> to vector<8x32xf32>
    %61 = math.tanh %60 : vector<8x32xf32>
    %c0_35 = arith.constant 0 : index
    %c32_36 = arith.constant 32 : index
    %62 = vector.load %arg8[%c0_35, %c32_36] : memref<8x64xf32, #tpu.memory_space<vmem>>, vector<8x32xf32>
    %63 = vector.extract_strided_slice %59 {offsets = [0, 0], sizes = [8, 32], strides = [1, 1]} : vector<8x96xf32> to vector<8x32xf32>
    %64 = arith.mulf %62, %63 : vector<8x32xf32>
    %65 = vector.extract_strided_slice %59 {offsets = [0, 32], sizes = [8, 32], strides = [1, 1]} : vector<8x96xf32> to vector<8x32xf32>
    %66 = arith.mulf %65, %61 : vector<8x32xf32>
    %67 = arith.addf %64, %66 : vector<8x32xf32>
    %68 = vector.extract_strided_slice %59 {offsets = [0, 64], sizes = [8, 32], strides = [1, 1]} : vector<8x96xf32> to vector<8x32xf32>
    %69 = math.tanh %67 : vector<8x32xf32>
    %70 = arith.mulf %68, %69 : vector<8x32xf32>
    %c0_37 = arith.constant 0 : index
    %c32_38 = arith.constant 32 : index
    %71 = vector.load %arg8[%c0_37, %c32_38] : memref<8x64xf32, #tpu.memory_space<vmem>>, vector<8x32xf32>
    tpu.vector_store %arg8[%c0_37, %c32_38], %67 {strides = array<i32>} : memref<8x64xf32, #tpu.memory_space<vmem>>, vector<8x32xf32>,
    %c0_39 = arith.constant 0 : index
    %c64_40 = arith.constant 64 : index
    %72 = vector.load %arg7[%c0_39, %c64_40] : memref<8x96xf32, #tpu.memory_space<vmem>>, vector<8x32xf32>
    tpu.vector_store %arg7[%c0_39, %c64_40], %70 {strides = array<i32>} : memref<8x96xf32, #tpu.memory_space<vmem>>, vector<8x32xf32>,
    %73 = arith.index_cast %c0_i32 : i32 to index
    %c0_41 = arith.constant 0 : index
    %c32_42 = arith.constant 32 : index
    %74 = vector.load %arg5[%73, %c0_41, %c32_42] : memref<8x8x128xf32, #tpu.memory_space<vmem>>, vector<1x8x32xf32>
    %75 = vector.shape_cast %74 : vector<1x8x32xf32> to vector<8x32xf32>
    %76 = vector.shape_cast %70 : vector<8x32xf32> to vector<1x8x32xf32>
    tpu.vector_store %arg5[%73, %c0_41, %c32_42], %76 {strides = array<i32>} : memref<8x8x128xf32, #tpu.memory_space<vmem>>, vector<1x8x32xf32>,
    %77 = arith.index_cast %c0_i32 : i32 to index
    %c0_43 = arith.constant 0 : index
    %c96 = arith.constant 96 : index
    %78 = vector.load %arg5[%77, %c0_43, %c96] : memref<8x8x128xf32, #tpu.memory_space<vmem>>, vector<1x8x32xf32>
    %79 = vector.shape_cast %78 : vector<1x8x32xf32> to vector<8x32xf32>
    %80 = vector.shape_cast %67 : vector<8x32xf32> to vector<1x8x32xf32>
    tpu.vector_store %arg5[%77, %c0_43, %c96], %80 {strides = array<i32>} : memref<8x8x128xf32, #tpu.memory_space<vmem>>, vector<1x8x32xf32>,
    %c1_i32 = arith.constant 1 : i32
    %c8_i32_44 = arith.constant 8 : i32
    %81 = arith.muli %c1_i32, %c8_i32_44 : i32
    %82 = tpu.assume_multiple %81, 8 : i32
    %83 = arith.index_cast %82 : i32 to index
    %c0_45 = arith.constant 0 : index
    %84 = vector.load %arg6[%83, %c0_45] : memref<64x256xf32, #tpu.memory_space<vmem>>, vector<8x256xf32>
    %c0_46 = arith.constant 0 : index
    %c0_47 = arith.constant 0 : index
    %85 = vector.load %arg7[%c0_46, %c0_47] : memref<8x96xf32, #tpu.memory_space<vmem>>, vector<8x64xf32>
    %86 = vector.extract_strided_slice %84 {offsets = [0, 0], sizes = [8, 128], strides = [1, 1]} : vector<8x256xf32> to vector<8x128xf32>
    %cst_48 = arith.constant dense<0.000000e+00> : vector<8x128xf32>
    %87 = tpu.matmul %85, %12, %cst_48 {dimension_numbers = #tpu.dot_dimension_numbers<[1], [0], [0], [1], [0, 0, 1, 1], [], []>} : vector<8x64xf32>, vector<64x128xf32>, vector<8x128xf32> -> vector<8x128xf32>
    %88 = arith.addf %86, %87 : vector<8x128xf32>
    %89 = vector.extract_strided_slice %88 {offsets = [0, 0], sizes = [8, 96], strides = [1, 1]} : vector<8x128xf32> to vector<8x96xf32>
    %90 = arith.negf %89 : vector<8x96xf32>
    %91 = math.exp %90 : vector<8x96xf32>
    %cst_49 = arith.constant 1.000000e+00 : f32
    %92 = vector.broadcast %cst_49 : f32 to vector<8x96xf32>
    %93 = arith.addf %92, %91 : vector<8x96xf32>
    %94 = arith.divf %92, %93 : vector<8x96xf32>
    %95 = vector.extract_strided_slice %88 {offsets = [0, 96], sizes = [8, 32], strides = [1, 1]} : vector<8x128xf32> to vector<8x32xf32>
    %96 = math.tanh %95 : vector<8x32xf32>
    %c0_50 = arith.constant 0 : index
    %c0_51 = arith.constant 0 : index
    %97 = vector.load %arg8[%c0_50, %c0_51] : memref<8x64xf32, #tpu.memory_space<vmem>>, vector<8x32xf32>
    %98 = vector.extract_strided_slice %94 {offsets = [0, 0], sizes = [8, 32], strides = [1, 1]} : vector<8x96xf32> to vector<8x32xf32>
    %99 = arith.mulf %97, %98 : vector<8x32xf32>
    %100 = vector.extract_strided_slice %94 {offsets = [0, 32], sizes = [8, 32], strides = [1, 1]} : vector<8x96xf32> to vector<8x32xf32>
    %101 = arith.mulf %100, %96 : vector<8x32xf32>
    %102 = arith.addf %99, %101 : vector<8x32xf32>
    %103 = vector.extract_strided_slice %94 {offsets = [0, 64], sizes = [8, 32], strides = [1, 1]} : vector<8x96xf32> to vector<8x32xf32>
    %104 = math.tanh %102 : vector<8x32xf32>
    %105 = arith.mulf %103, %104 : vector<8x32xf32>
    %c0_52 = arith.constant 0 : index
    %c0_53 = arith.constant 0 : index
    %106 = vector.load %arg8[%c0_52, %c0_53] : memref<8x64xf32, #tpu.memory_space<vmem>>, vector<8x32xf32>
    tpu.vector_store %arg8[%c0_52, %c0_53], %102 {strides = array<i32>} : memref<8x64xf32, #tpu.memory_space<vmem>>, vector<8x32xf32>,
    %c0_54 = arith.constant 0 : index
    %c32_55 = arith.constant 32 : index
    %107 = vector.load %arg7[%c0_54, %c32_55] : memref<8x96xf32, #tpu.memory_space<vmem>>, vector<8x32xf32>
    tpu.vector_store %arg7[%c0_54, %c32_55], %105 {strides = array<i32>} : memref<8x96xf32, #tpu.memory_space<vmem>>, vector<8x32xf32>,
    %108 = arith.index_cast %c1_i32 : i32 to index
    %c0_56 = arith.constant 0 : index
    %c0_57 = arith.constant 0 : index
    %109 = vector.load %arg5[%108, %c0_56, %c0_57] : memref<8x8x128xf32, #tpu.memory_space<vmem>>, vector<1x8x32xf32>
    %110 = vector.shape_cast %109 : vector<1x8x32xf32> to vector<8x32xf32>
    %111 = vector.shape_cast %105 : vector<8x32xf32> to vector<1x8x32xf32>
    tpu.vector_store %arg5[%108, %c0_56, %c0_57], %111 {strides = array<i32>} : memref<8x8x128xf32, #tpu.memory_space<vmem>>, vector<1x8x32xf32>,
    %112 = arith.index_cast %c1_i32 : i32 to index
    %c0_58 = arith.constant 0 : index
    %c64_59 = arith.constant 64 : index
    %113 = vector.load %arg5[%112, %c0_58, %c64_59] : memref<8x8x128xf32, #tpu.memory_space<vmem>>, vector<1x8x32xf32>
    %114 = vector.shape_cast %113 : vector<1x8x32xf32> to vector<8x32xf32>
    %115 = vector.shape_cast %102 : vector<8x32xf32> to vector<1x8x32xf32>
    tpu.vector_store %arg5[%112, %c0_58, %c64_59], %115 {strides = array<i32>} : memref<8x8x128xf32, #tpu.memory_space<vmem>>, vector<1x8x32xf32>,
    %c0_60 = arith.constant 0 : index
    %c32_61 = arith.constant 32 : index
    %116 = vector.load %arg7[%c0_60, %c32_61] : memref<8x96xf32, #tpu.memory_space<vmem>>, vector<8x64xf32>
    %117 = vector.extract_strided_slice %84 {offsets = [0, 128], sizes = [8, 128], strides = [1, 1]} : vector<8x256xf32> to vector<8x128xf32>
    %cst_62 = arith.constant dense<0.000000e+00> : vector<8x128xf32>
    %118 = tpu.matmul %116, %14, %cst_62 {dimension_numbers = #tpu.dot_dimension_numbers<[1], [0], [0], [1], [0, 0, 1, 1], [], []>} : vector<8x64xf32>, vector<64x128xf32>, vector<8x128xf32> -> vector<8x128xf32>
    %119 = arith.addf %117, %118 : vector<8x128xf32>
    %120 = vector.extract_strided_slice %119 {offsets = [0, 0], sizes = [8, 96], strides = [1, 1]} : vector<8x128xf32> to vector<8x96xf32>
    %121 = arith.negf %120 : vector<8x96xf32>
    %122 = math.exp %121 : vector<8x96xf32>
    %cst_63 = arith.constant 1.000000e+00 : f32
    %123 = vector.broadcast %cst_63 : f32 to vector<8x96xf32>
    %124 = arith.addf %123, %122 : vector<8x96xf32>
    %125 = arith.divf %123, %124 : vector<8x96xf32>
    %126 = vector.extract_strided_slice %119 {offsets = [0, 96], sizes = [8, 32], strides = [1, 1]} : vector<8x128xf32> to vector<8x32xf32>
    %127 = math.tanh %126 : vector<8x32xf32>
    %c0_64 = arith.constant 0 : index
    %c32_65 = arith.constant 32 : index
    %128 = vector.load %arg8[%c0_64, %c32_65] : memref<8x64xf32, #tpu.memory_space<vmem>>, vector<8x32xf32>
    %129 = vector.extract_strided_slice %125 {offsets = [0, 0], sizes = [8, 32], strides = [1, 1]} : vector<8x96xf32> to vector<8x32xf32>
    %130 = arith.mulf %128, %129 : vector<8x32xf32>
    %131 = vector.extract_strided_slice %125 {offsets = [0, 32], sizes = [8, 32], strides = [1, 1]} : vector<8x96xf32> to vector<8x32xf32>
    %132 = arith.mulf %131, %127 : vector<8x32xf32>
    %133 = arith.addf %130, %132 : vector<8x32xf32>
    %134 = vector.extract_strided_slice %125 {offsets = [0, 64], sizes = [8, 32], strides = [1, 1]} : vector<8x96xf32> to vector<8x32xf32>
    %135 = math.tanh %133 : vector<8x32xf32>
    %136 = arith.mulf %134, %135 : vector<8x32xf32>
    %c0_66 = arith.constant 0 : index
    %c32_67 = arith.constant 32 : index
    %137 = vector.load %arg8[%c0_66, %c32_67] : memref<8x64xf32, #tpu.memory_space<vmem>>, vector<8x32xf32>
    tpu.vector_store %arg8[%c0_66, %c32_67], %133 {strides = array<i32>} : memref<8x64xf32, #tpu.memory_space<vmem>>, vector<8x32xf32>,
    %c0_68 = arith.constant 0 : index
    %c64_69 = arith.constant 64 : index
    %138 = vector.load %arg7[%c0_68, %c64_69] : memref<8x96xf32, #tpu.memory_space<vmem>>, vector<8x32xf32>
    tpu.vector_store %arg7[%c0_68, %c64_69], %136 {strides = array<i32>} : memref<8x96xf32, #tpu.memory_space<vmem>>, vector<8x32xf32>,
    %139 = arith.index_cast %c1_i32 : i32 to index
    %c0_70 = arith.constant 0 : index
    %c32_71 = arith.constant 32 : index
    %140 = vector.load %arg5[%139, %c0_70, %c32_71] : memref<8x8x128xf32, #tpu.memory_space<vmem>>, vector<1x8x32xf32>
    %141 = vector.shape_cast %140 : vector<1x8x32xf32> to vector<8x32xf32>
    %142 = vector.shape_cast %136 : vector<8x32xf32> to vector<1x8x32xf32>
    tpu.vector_store %arg5[%139, %c0_70, %c32_71], %142 {strides = array<i32>} : memref<8x8x128xf32, #tpu.memory_space<vmem>>, vector<1x8x32xf32>,
    %143 = arith.index_cast %c1_i32 : i32 to index
    %c0_72 = arith.constant 0 : index
    %c96_73 = arith.constant 96 : index
    %144 = vector.load %arg5[%143, %c0_72, %c96_73] : memref<8x8x128xf32, #tpu.memory_space<vmem>>, vector<1x8x32xf32>
    %145 = vector.shape_cast %144 : vector<1x8x32xf32> to vector<8x32xf32>
    %146 = vector.shape_cast %133 : vector<8x32xf32> to vector<1x8x32xf32>
    tpu.vector_store %arg5[%143, %c0_72, %c96_73], %146 {strides = array<i32>} : memref<8x8x128xf32, #tpu.memory_space<vmem>>, vector<1x8x32xf32>,
    %c2_i32 = arith.constant 2 : i32
    %c8_i32_74 = arith.constant 8 : i32
    %147 = arith.muli %c2_i32, %c8_i32_74 : i32
    %148 = tpu.assume_multiple %147, 8 : i32
    %149 = arith.index_cast %148 : i32 to index
    %c0_75 = arith.constant 0 : index
    %150 = vector.load %arg6[%149, %c0_75] : memref<64x256xf32, #tpu.memory_space<vmem>>, vector<8x256xf32>
    %c0_76 = arith.constant 0 : index
    %c0_77 = arith.constant 0 : index
    %151 = vector.load %arg7[%c0_76, %c0_77] : memref<8x96xf32, #tpu.memory_space<vmem>>, vector<8x64xf32>
    %152 = vector.extract_strided_slice %150 {offsets = [0, 0], sizes = [8, 128], strides = [1, 1]} : vector<8x256xf32> to vector<8x128xf32>
    %cst_78 = arith.constant dense<0.000000e+00> : vector<8x128xf32>
    %153 = tpu.matmul %151, %12, %cst_78 {dimension_numbers = #tpu.dot_dimension_numbers<[1], [0], [0], [1], [0, 0, 1, 1], [], []>} : vector<8x64xf32>, vector<64x128xf32>, vector<8x128xf32> -> vector<8x128xf32>
    %154 = arith.addf %152, %153 : vector<8x128xf32>
    %155 = vector.extract_strided_slice %154 {offsets = [0, 0], sizes = [8, 96], strides = [1, 1]} : vector<8x128xf32> to vector<8x96xf32>
    %156 = arith.negf %155 : vector<8x96xf32>
    %157 = math.exp %156 : vector<8x96xf32>
    %cst_79 = arith.constant 1.000000e+00 : f32
    %158 = vector.broadcast %cst_79 : f32 to vector<8x96xf32>
    %159 = arith.addf %158, %157 : vector<8x96xf32>
    %160 = arith.divf %158, %159 : vector<8x96xf32>
    %161 = vector.extract_strided_slice %154 {offsets = [0, 96], sizes = [8, 32], strides = [1, 1]} : vector<8x128xf32> to vector<8x32xf32>
    %162 = math.tanh %161 : vector<8x32xf32>
    %c0_80 = arith.constant 0 : index
    %c0_81 = arith.constant 0 : index
    %163 = vector.load %arg8[%c0_80, %c0_81] : memref<8x64xf32, #tpu.memory_space<vmem>>, vector<8x32xf32>
    %164 = vector.extract_strided_slice %160 {offsets = [0, 0], sizes = [8, 32], strides = [1, 1]} : vector<8x96xf32> to vector<8x32xf32>
    %165 = arith.mulf %163, %164 : vector<8x32xf32>
    %166 = vector.extract_strided_slice %160 {offsets = [0, 32], sizes = [8, 32], strides = [1, 1]} : vector<8x96xf32> to vector<8x32xf32>
    %167 = arith.mulf %166, %162 : vector<8x32xf32>
    %168 = arith.addf %165, %167 : vector<8x32xf32>
    %169 = vector.extract_strided_slice %160 {offsets = [0, 64], sizes = [8, 32], strides = [1, 1]} : vector<8x96xf32> to vector<8x32xf32>
    %170 = math.tanh %168 : vector<8x32xf32>
    %171 = arith.mulf %169, %170 : vector<8x32xf32>
    %c0_82 = arith.constant 0 : index
    %c0_83 = arith.constant 0 : index
    %172 = vector.load %arg8[%c0_82, %c0_83] : memref<8x64xf32, #tpu.memory_space<vmem>>, vector<8x32xf32>
    tpu.vector_store %arg8[%c0_82, %c0_83], %168 {strides = array<i32>} : memref<8x64xf32, #tpu.memory_space<vmem>>, vector<8x32xf32>,
    %c0_84 = arith.constant 0 : index
    %c32_85 = arith.constant 32 : index
    %173 = vector.load %arg7[%c0_84, %c32_85] : memref<8x96xf32, #tpu.memory_space<vmem>>, vector<8x32xf32>
    tpu.vector_store %arg7[%c0_84, %c32_85], %171 {strides = array<i32>} : memref<8x96xf32, #tpu.memory_space<vmem>>, vector<8x32xf32>,
    %174 = arith.index_cast %c2_i32 : i32 to index
    %c0_86 = arith.constant 0 : index
    %c0_87 = arith.constant 0 : index
    %175 = vector.load %arg5[%174, %c0_86, %c0_87] : memref<8x8x128xf32, #tpu.memory_space<vmem>>, vector<1x8x32xf32>
    %176 = vector.shape_cast %175 : vector<1x8x32xf32> to vector<8x32xf32>
    %177 = vector.shape_cast %171 : vector<8x32xf32> to vector<1x8x32xf32>
    tpu.vector_store %arg5[%174, %c0_86, %c0_87], %177 {strides = array<i32>} : memref<8x8x128xf32, #tpu.memory_space<vmem>>, vector<1x8x32xf32>,
    %178 = arith.index_cast %c2_i32 : i32 to index
    %c0_88 = arith.constant 0 : index
    %c64_89 = arith.constant 64 : index
    %179 = vector.load %arg5[%178, %c0_88, %c64_89] : memref<8x8x128xf32, #tpu.memory_space<vmem>>, vector<1x8x32xf32>
    %180 = vector.shape_cast %179 : vector<1x8x32xf32> to vector<8x32xf32>
    %181 = vector.shape_cast %168 : vector<8x32xf32> to vector<1x8x32xf32>
    tpu.vector_store %arg5[%178, %c0_88, %c64_89], %181 {strides = array<i32>} : memref<8x8x128xf32, #tpu.memory_space<vmem>>, vector<1x8x32xf32>,
    %c0_90 = arith.constant 0 : index
    %c32_91 = arith.constant 32 : index
    %182 = vector.load %arg7[%c0_90, %c32_91] : memref<8x96xf32, #tpu.memory_space<vmem>>, vector<8x64xf32>
    %183 = vector.extract_strided_slice %150 {offsets = [0, 128], sizes = [8, 128], strides = [1, 1]} : vector<8x256xf32> to vector<8x128xf32>
    %cst_92 = arith.constant dense<0.000000e+00> : vector<8x128xf32>
    %184 = tpu.matmul %182, %14, %cst_92 {dimension_numbers = #tpu.dot_dimension_numbers<[1], [0], [0], [1], [0, 0, 1, 1], [], []>} : vector<8x64xf32>, vector<64x128xf32>, vector<8x128xf32> -> vector<8x128xf32>
    %185 = arith.addf %183, %184 : vector<8x128xf32>
    %186 = vector.extract_strided_slice %185 {offsets = [0, 0], sizes = [8, 96], strides = [1, 1]} : vector<8x128xf32> to vector<8x96xf32>
    %187 = arith.negf %186 : vector<8x96xf32>
    %188 = math.exp %187 : vector<8x96xf32>
    %cst_93 = arith.constant 1.000000e+00 : f32
    %189 = vector.broadcast %cst_93 : f32 to vector<8x96xf32>
    %190 = arith.addf %189, %188 : vector<8x96xf32>
    %191 = arith.divf %189, %190 : vector<8x96xf32>
    %192 = vector.extract_strided_slice %185 {offsets = [0, 96], sizes = [8, 32], strides = [1, 1]} : vector<8x128xf32> to vector<8x32xf32>
    %193 = math.tanh %192 : vector<8x32xf32>
    %c0_94 = arith.constant 0 : index
    %c32_95 = arith.constant 32 : index
    %194 = vector.load %arg8[%c0_94, %c32_95] : memref<8x64xf32, #tpu.memory_space<vmem>>, vector<8x32xf32>
    %195 = vector.extract_strided_slice %191 {offsets = [0, 0], sizes = [8, 32], strides = [1, 1]} : vector<8x96xf32> to vector<8x32xf32>
    %196 = arith.mulf %194, %195 : vector<8x32xf32>
    %197 = vector.extract_strided_slice %191 {offsets = [0, 32], sizes = [8, 32], strides = [1, 1]} : vector<8x96xf32> to vector<8x32xf32>
    %198 = arith.mulf %197, %193 : vector<8x32xf32>
    %199 = arith.addf %196, %198 : vector<8x32xf32>
    %200 = vector.extract_strided_slice %191 {offsets = [0, 64], sizes = [8, 32], strides = [1, 1]} : vector<8x96xf32> to vector<8x32xf32>
    %201 = math.tanh %199 : vector<8x32xf32>
    %202 = arith.mulf %200, %201 : vector<8x32xf32>
    %c0_96 = arith.constant 0 : index
    %c32_97 = arith.constant 32 : index
    %203 = vector.load %arg8[%c0_96, %c32_97] : memref<8x64xf32, #tpu.memory_space<vmem>>, vector<8x32xf32>
    tpu.vector_store %arg8[%c0_96, %c32_97], %199 {strides = array<i32>} : memref<8x64xf32, #tpu.memory_space<vmem>>, vector<8x32xf32>,
    %c0_98 = arith.constant 0 : index
    %c64_99 = arith.constant 64 : index
    %204 = vector.load %arg7[%c0_98, %c64_99] : memref<8x96xf32, #tpu.memory_space<vmem>>, vector<8x32xf32>
    tpu.vector_store %arg7[%c0_98, %c64_99], %202 {strides = array<i32>} : memref<8x96xf32, #tpu.memory_space<vmem>>, vector<8x32xf32>,
    %205 = arith.index_cast %c2_i32 : i32 to index
    %c0_100 = arith.constant 0 : index
    %c32_101 = arith.constant 32 : index
    %206 = vector.load %arg5[%205, %c0_100, %c32_101] : memref<8x8x128xf32, #tpu.memory_space<vmem>>, vector<1x8x32xf32>
    %207 = vector.shape_cast %206 : vector<1x8x32xf32> to vector<8x32xf32>
    %208 = vector.shape_cast %202 : vector<8x32xf32> to vector<1x8x32xf32>
    tpu.vector_store %arg5[%205, %c0_100, %c32_101], %208 {strides = array<i32>} : memref<8x8x128xf32, #tpu.memory_space<vmem>>, vector<1x8x32xf32>,
    %209 = arith.index_cast %c2_i32 : i32 to index
    %c0_102 = arith.constant 0 : index
    %c96_103 = arith.constant 96 : index
    %210 = vector.load %arg5[%209, %c0_102, %c96_103] : memref<8x8x128xf32, #tpu.memory_space<vmem>>, vector<1x8x32xf32>
    %211 = vector.shape_cast %210 : vector<1x8x32xf32> to vector<8x32xf32>
    %212 = vector.shape_cast %199 : vector<8x32xf32> to vector<1x8x32xf32>
    tpu.vector_store %arg5[%209, %c0_102, %c96_103], %212 {strides = array<i32>} : memref<8x8x128xf32, #tpu.memory_space<vmem>>, vector<1x8x32xf32>,
    %c3_i32 = arith.constant 3 : i32
    %c8_i32_104 = arith.constant 8 : i32
    %213 = arith.muli %c3_i32, %c8_i32_104 : i32
    %214 = tpu.assume_multiple %213, 8 : i32
    %215 = arith.index_cast %214 : i32 to index
    %c0_105 = arith.constant 0 : index
    %216 = vector.load %arg6[%215, %c0_105] : memref<64x256xf32, #tpu.memory_space<vmem>>, vector<8x256xf32>
    %c0_106 = arith.constant 0 : index
    %c0_107 = arith.constant 0 : index
    %217 = vector.load %arg7[%c0_106, %c0_107] : memref<8x96xf32, #tpu.memory_space<vmem>>, vector<8x64xf32>
    %218 = vector.extract_strided_slice %216 {offsets = [0, 0], sizes = [8, 128], strides = [1, 1]} : vector<8x256xf32> to vector<8x128xf32>
    %cst_108 = arith.constant dense<0.000000e+00> : vector<8x128xf32>
    %219 = tpu.matmul %217, %12, %cst_108 {dimension_numbers = #tpu.dot_dimension_numbers<[1], [0], [0], [1], [0, 0, 1, 1], [], []>} : vector<8x64xf32>, vector<64x128xf32>, vector<8x128xf32> -> vector<8x128xf32>
    %220 = arith.addf %218, %219 : vector<8x128xf32>
    %221 = vector.extract_strided_slice %220 {offsets = [0, 0], sizes = [8, 96], strides = [1, 1]} : vector<8x128xf32> to vector<8x96xf32>
    %222 = arith.negf %221 : vector<8x96xf32>
    %223 = math.exp %222 : vector<8x96xf32>
    %cst_109 = arith.constant 1.000000e+00 : f32
    %224 = vector.broadcast %cst_109 : f32 to vector<8x96xf32>
    %225 = arith.addf %224, %223 : vector<8x96xf32>
    %226 = arith.divf %224, %225 : vector<8x96xf32>
    %227 = vector.extract_strided_slice %220 {offsets = [0, 96], sizes = [8, 32], strides = [1, 1]} : vector<8x128xf32> to vector<8x32xf32>
    %228 = math.tanh %227 : vector<8x32xf32>
    %c0_110 = arith.constant 0 : index
    %c0_111 = arith.constant 0 : index
    %229 = vector.load %arg8[%c0_110, %c0_111] : memref<8x64xf32, #tpu.memory_space<vmem>>, vector<8x32xf32>
    %230 = vector.extract_strided_slice %226 {offsets = [0, 0], sizes = [8, 32], strides = [1, 1]} : vector<8x96xf32> to vector<8x32xf32>
    %231 = arith.mulf %229, %230 : vector<8x32xf32>
    %232 = vector.extract_strided_slice %226 {offsets = [0, 32], sizes = [8, 32], strides = [1, 1]} : vector<8x96xf32> to vector<8x32xf32>
    %233 = arith.mulf %232, %228 : vector<8x32xf32>
    %234 = arith.addf %231, %233 : vector<8x32xf32>
    %235 = vector.extract_strided_slice %226 {offsets = [0, 64], sizes = [8, 32], strides = [1, 1]} : vector<8x96xf32> to vector<8x32xf32>
    %236 = math.tanh %234 : vector<8x32xf32>
    %237 = arith.mulf %235, %236 : vector<8x32xf32>
    %c0_112 = arith.constant 0 : index
    %c0_113 = arith.constant 0 : index
    %238 = vector.load %arg8[%c0_112, %c0_113] : memref<8x64xf32, #tpu.memory_space<vmem>>, vector<8x32xf32>
    tpu.vector_store %arg8[%c0_112, %c0_113], %234 {strides = array<i32>} : memref<8x64xf32, #tpu.memory_space<vmem>>, vector<8x32xf32>,
    %c0_114 = arith.constant 0 : index
    %c32_115 = arith.constant 32 : index
    %239 = vector.load %arg7[%c0_114, %c32_115] : memref<8x96xf32, #tpu.memory_space<vmem>>, vector<8x32xf32>
    tpu.vector_store %arg7[%c0_114, %c32_115], %237 {strides = array<i32>} : memref<8x96xf32, #tpu.memory_space<vmem>>, vector<8x32xf32>,
    %240 = arith.index_cast %c3_i32 : i32 to index
    %c0_116 = arith.constant 0 : index
    %c0_117 = arith.constant 0 : index
    %241 = vector.load %arg5[%240, %c0_116, %c0_117] : memref<8x8x128xf32, #tpu.memory_space<vmem>>, vector<1x8x32xf32>
    %242 = vector.shape_cast %241 : vector<1x8x32xf32> to vector<8x32xf32>
    %243 = vector.shape_cast %237 : vector<8x32xf32> to vector<1x8x32xf32>
    tpu.vector_store %arg5[%240, %c0_116, %c0_117], %243 {strides = array<i32>} : memref<8x8x128xf32, #tpu.memory_space<vmem>>, vector<1x8x32xf32>,
    %244 = arith.index_cast %c3_i32 : i32 to index
    %c0_118 = arith.constant 0 : index
    %c64_119 = arith.constant 64 : index
    %245 = vector.load %arg5[%244, %c0_118, %c64_119] : memref<8x8x128xf32, #tpu.memory_space<vmem>>, vector<1x8x32xf32>
    %246 = vector.shape_cast %245 : vector<1x8x32xf32> to vector<8x32xf32>
    %247 = vector.shape_cast %234 : vector<8x32xf32> to vector<1x8x32xf32>
    tpu.vector_store %arg5[%244, %c0_118, %c64_119], %247 {strides = array<i32>} : memref<8x8x128xf32, #tpu.memory_space<vmem>>, vector<1x8x32xf32>,
    %c0_120 = arith.constant 0 : index
    %c32_121 = arith.constant 32 : index
    %248 = vector.load %arg7[%c0_120, %c32_121] : memref<8x96xf32, #tpu.memory_space<vmem>>, vector<8x64xf32>
    %249 = vector.extract_strided_slice %216 {offsets = [0, 128], sizes = [8, 128], strides = [1, 1]} : vector<8x256xf32> to vector<8x128xf32>
    %cst_122 = arith.constant dense<0.000000e+00> : vector<8x128xf32>
    %250 = tpu.matmul %248, %14, %cst_122 {dimension_numbers = #tpu.dot_dimension_numbers<[1], [0], [0], [1], [0, 0, 1, 1], [], []>} : vector<8x64xf32>, vector<64x128xf32>, vector<8x128xf32> -> vector<8x128xf32>
    %251 = arith.addf %249, %250 : vector<8x128xf32>
    %252 = vector.extract_strided_slice %251 {offsets = [0, 0], sizes = [8, 96], strides = [1, 1]} : vector<8x128xf32> to vector<8x96xf32>
    %253 = arith.negf %252 : vector<8x96xf32>
    %254 = math.exp %253 : vector<8x96xf32>
    %cst_123 = arith.constant 1.000000e+00 : f32
    %255 = vector.broadcast %cst_123 : f32 to vector<8x96xf32>
    %256 = arith.addf %255, %254 : vector<8x96xf32>
    %257 = arith.divf %255, %256 : vector<8x96xf32>
    %258 = vector.extract_strided_slice %251 {offsets = [0, 96], sizes = [8, 32], strides = [1, 1]} : vector<8x128xf32> to vector<8x32xf32>
    %259 = math.tanh %258 : vector<8x32xf32>
    %c0_124 = arith.constant 0 : index
    %c32_125 = arith.constant 32 : index
    %260 = vector.load %arg8[%c0_124, %c32_125] : memref<8x64xf32, #tpu.memory_space<vmem>>, vector<8x32xf32>
    %261 = vector.extract_strided_slice %257 {offsets = [0, 0], sizes = [8, 32], strides = [1, 1]} : vector<8x96xf32> to vector<8x32xf32>
    %262 = arith.mulf %260, %261 : vector<8x32xf32>
    %263 = vector.extract_strided_slice %257 {offsets = [0, 32], sizes = [8, 32], strides = [1, 1]} : vector<8x96xf32> to vector<8x32xf32>
    %264 = arith.mulf %263, %259 : vector<8x32xf32>
    %265 = arith.addf %262, %264 : vector<8x32xf32>
    %266 = vector.extract_strided_slice %257 {offsets = [0, 64], sizes = [8, 32], strides = [1, 1]} : vector<8x96xf32> to vector<8x32xf32>
    %267 = math.tanh %265 : vector<8x32xf32>
    %268 = arith.mulf %266, %267 : vector<8x32xf32>
    %c0_126 = arith.constant 0 : index
    %c32_127 = arith.constant 32 : index
    %269 = vector.load %arg8[%c0_126, %c32_127] : memref<8x64xf32, #tpu.memory_space<vmem>>, vector<8x32xf32>
    tpu.vector_store %arg8[%c0_126, %c32_127], %265 {strides = array<i32>} : memref<8x64xf32, #tpu.memory_space<vmem>>, vector<8x32xf32>,
    %c0_128 = arith.constant 0 : index
    %c64_129 = arith.constant 64 : index
    %270 = vector.load %arg7[%c0_128, %c64_129] : memref<8x96xf32, #tpu.memory_space<vmem>>, vector<8x32xf32>
    tpu.vector_store %arg7[%c0_128, %c64_129], %268 {strides = array<i32>} : memref<8x96xf32, #tpu.memory_space<vmem>>, vector<8x32xf32>,
    %271 = arith.index_cast %c3_i32 : i32 to index
    %c0_130 = arith.constant 0 : index
    %c32_131 = arith.constant 32 : index
    %272 = vector.load %arg5[%271, %c0_130, %c32_131] : memref<8x8x128xf32, #tpu.memory_space<vmem>>, vector<1x8x32xf32>
    %273 = vector.shape_cast %272 : vector<1x8x32xf32> to vector<8x32xf32>
    %274 = vector.shape_cast %268 : vector<8x32xf32> to vector<1x8x32xf32>
    tpu.vector_store %arg5[%271, %c0_130, %c32_131], %274 {strides = array<i32>} : memref<8x8x128xf32, #tpu.memory_space<vmem>>, vector<1x8x32xf32>,
    %275 = arith.index_cast %c3_i32 : i32 to index
    %c0_132 = arith.constant 0 : index
    %c96_133 = arith.constant 96 : index
    %276 = vector.load %arg5[%275, %c0_132, %c96_133] : memref<8x8x128xf32, #tpu.memory_space<vmem>>, vector<1x8x32xf32>
    %277 = vector.shape_cast %276 : vector<1x8x32xf32> to vector<8x32xf32>
    %278 = vector.shape_cast %265 : vector<8x32xf32> to vector<1x8x32xf32>
    tpu.vector_store %arg5[%275, %c0_132, %c96_133], %278 {strides = array<i32>} : memref<8x8x128xf32, #tpu.memory_space<vmem>>, vector<1x8x32xf32>,
    %c4_i32 = arith.constant 4 : i32
    %c8_i32_134 = arith.constant 8 : i32
    %279 = arith.muli %c4_i32, %c8_i32_134 : i32
    %280 = tpu.assume_multiple %279, 8 : i32
    %281 = arith.index_cast %280 : i32 to index
    %c0_135 = arith.constant 0 : index
    %282 = vector.load %arg6[%281, %c0_135] : memref<64x256xf32, #tpu.memory_space<vmem>>, vector<8x256xf32>
    %c0_136 = arith.constant 0 : index
    %c0_137 = arith.constant 0 : index
    %283 = vector.load %arg7[%c0_136, %c0_137] : memref<8x96xf32, #tpu.memory_space<vmem>>, vector<8x64xf32>
    %284 = vector.extract_strided_slice %282 {offsets = [0, 0], sizes = [8, 128], strides = [1, 1]} : vector<8x256xf32> to vector<8x128xf32>
    %cst_138 = arith.constant dense<0.000000e+00> : vector<8x128xf32>
    %285 = tpu.matmul %283, %12, %cst_138 {dimension_numbers = #tpu.dot_dimension_numbers<[1], [0], [0], [1], [0, 0, 1, 1], [], []>} : vector<8x64xf32>, vector<64x128xf32>, vector<8x128xf32> -> vector<8x128xf32>
    %286 = arith.addf %284, %285 : vector<8x128xf32>
    %287 = vector.extract_strided_slice %286 {offsets = [0, 0], sizes = [8, 96], strides = [1, 1]} : vector<8x128xf32> to vector<8x96xf32>
    %288 = arith.negf %287 : vector<8x96xf32>
    %289 = math.exp %288 : vector<8x96xf32>
    %cst_139 = arith.constant 1.000000e+00 : f32
    %290 = vector.broadcast %cst_139 : f32 to vector<8x96xf32>
    %291 = arith.addf %290, %289 : vector<8x96xf32>
    %292 = arith.divf %290, %291 : vector<8x96xf32>
    %293 = vector.extract_strided_slice %286 {offsets = [0, 96], sizes = [8, 32], strides = [1, 1]} : vector<8x128xf32> to vector<8x32xf32>
    %294 = math.tanh %293 : vector<8x32xf32>
    %c0_140 = arith.constant 0 : index
    %c0_141 = arith.constant 0 : index
    %295 = vector.load %arg8[%c0_140, %c0_141] : memref<8x64xf32, #tpu.memory_space<vmem>>, vector<8x32xf32>
    %296 = vector.extract_strided_slice %292 {offsets = [0, 0], sizes = [8, 32], strides = [1, 1]} : vector<8x96xf32> to vector<8x32xf32>
    %297 = arith.mulf %295, %296 : vector<8x32xf32>
    %298 = vector.extract_strided_slice %292 {offsets = [0, 32], sizes = [8, 32], strides = [1, 1]} : vector<8x96xf32> to vector<8x32xf32>
    %299 = arith.mulf %298, %294 : vector<8x32xf32>
    %300 = arith.addf %297, %299 : vector<8x32xf32>
    %301 = vector.extract_strided_slice %292 {offsets = [0, 64], sizes = [8, 32], strides = [1, 1]} : vector<8x96xf32> to vector<8x32xf32>
    %302 = math.tanh %300 : vector<8x32xf32>
    %303 = arith.mulf %301, %302 : vector<8x32xf32>
    %c0_142 = arith.constant 0 : index
    %c0_143 = arith.constant 0 : index
    %304 = vector.load %arg8[%c0_142, %c0_143] : memref<8x64xf32, #tpu.memory_space<vmem>>, vector<8x32xf32>
    tpu.vector_store %arg8[%c0_142, %c0_143], %300 {strides = array<i32>} : memref<8x64xf32, #tpu.memory_space<vmem>>, vector<8x32xf32>,
    %c0_144 = arith.constant 0 : index
    %c32_145 = arith.constant 32 : index
    %305 = vector.load %arg7[%c0_144, %c32_145] : memref<8x96xf32, #tpu.memory_space<vmem>>, vector<8x32xf32>
    tpu.vector_store %arg7[%c0_144, %c32_145], %303 {strides = array<i32>} : memref<8x96xf32, #tpu.memory_space<vmem>>, vector<8x32xf32>,
    %306 = arith.index_cast %c4_i32 : i32 to index
    %c0_146 = arith.constant 0 : index
    %c0_147 = arith.constant 0 : index
    %307 = vector.load %arg5[%306, %c0_146, %c0_147] : memref<8x8x128xf32, #tpu.memory_space<vmem>>, vector<1x8x32xf32>
    %308 = vector.shape_cast %307 : vector<1x8x32xf32> to vector<8x32xf32>
    %309 = vector.shape_cast %303 : vector<8x32xf32> to vector<1x8x32xf32>
    tpu.vector_store %arg5[%306, %c0_146, %c0_147], %309 {strides = array<i32>} : memref<8x8x128xf32, #tpu.memory_space<vmem>>, vector<1x8x32xf32>,
    %310 = arith.index_cast %c4_i32 : i32 to index
    %c0_148 = arith.constant 0 : index
    %c64_149 = arith.constant 64 : index
    %311 = vector.load %arg5[%310, %c0_148, %c64_149] : memref<8x8x128xf32, #tpu.memory_space<vmem>>, vector<1x8x32xf32>
    %312 = vector.shape_cast %311 : vector<1x8x32xf32> to vector<8x32xf32>
    %313 = vector.shape_cast %300 : vector<8x32xf32> to vector<1x8x32xf32>
    tpu.vector_store %arg5[%310, %c0_148, %c64_149], %313 {strides = array<i32>} : memref<8x8x128xf32, #tpu.memory_space<vmem>>, vector<1x8x32xf32>,
    %c0_150 = arith.constant 0 : index
    %c32_151 = arith.constant 32 : index
    %314 = vector.load %arg7[%c0_150, %c32_151] : memref<8x96xf32, #tpu.memory_space<vmem>>, vector<8x64xf32>
    %315 = vector.extract_strided_slice %282 {offsets = [0, 128], sizes = [8, 128], strides = [1, 1]} : vector<8x256xf32> to vector<8x128xf32>
    %cst_152 = arith.constant dense<0.000000e+00> : vector<8x128xf32>
    %316 = tpu.matmul %314, %14, %cst_152 {dimension_numbers = #tpu.dot_dimension_numbers<[1], [0], [0], [1], [0, 0, 1, 1], [], []>} : vector<8x64xf32>, vector<64x128xf32>, vector<8x128xf32> -> vector<8x128xf32>
    %317 = arith.addf %315, %316 : vector<8x128xf32>
    %318 = vector.extract_strided_slice %317 {offsets = [0, 0], sizes = [8, 96], strides = [1, 1]} : vector<8x128xf32> to vector<8x96xf32>
    %319 = arith.negf %318 : vector<8x96xf32>
    %320 = math.exp %319 : vector<8x96xf32>
    %cst_153 = arith.constant 1.000000e+00 : f32
    %321 = vector.broadcast %cst_153 : f32 to vector<8x96xf32>
    %322 = arith.addf %321, %320 : vector<8x96xf32>
    %323 = arith.divf %321, %322 : vector<8x96xf32>
    %324 = vector.extract_strided_slice %317 {offsets = [0, 96], sizes = [8, 32], strides = [1, 1]} : vector<8x128xf32> to vector<8x32xf32>
    %325 = math.tanh %324 : vector<8x32xf32>
    %c0_154 = arith.constant 0 : index
    %c32_155 = arith.constant 32 : index
    %326 = vector.load %arg8[%c0_154, %c32_155] : memref<8x64xf32, #tpu.memory_space<vmem>>, vector<8x32xf32>
    %327 = vector.extract_strided_slice %323 {offsets = [0, 0], sizes = [8, 32], strides = [1, 1]} : vector<8x96xf32> to vector<8x32xf32>
    %328 = arith.mulf %326, %327 : vector<8x32xf32>
    %329 = vector.extract_strided_slice %323 {offsets = [0, 32], sizes = [8, 32], strides = [1, 1]} : vector<8x96xf32> to vector<8x32xf32>
    %330 = arith.mulf %329, %325 : vector<8x32xf32>
    %331 = arith.addf %328, %330 : vector<8x32xf32>
    %332 = vector.extract_strided_slice %323 {offsets = [0, 64], sizes = [8, 32], strides = [1, 1]} : vector<8x96xf32> to vector<8x32xf32>
    %333 = math.tanh %331 : vector<8x32xf32>
    %334 = arith.mulf %332, %333 : vector<8x32xf32>
    %c0_156 = arith.constant 0 : index
    %c32_157 = arith.constant 32 : index
    %335 = vector.load %arg8[%c0_156, %c32_157] : memref<8x64xf32, #tpu.memory_space<vmem>>, vector<8x32xf32>
    tpu.vector_store %arg8[%c0_156, %c32_157], %331 {strides = array<i32>} : memref<8x64xf32, #tpu.memory_space<vmem>>, vector<8x32xf32>,
    %c0_158 = arith.constant 0 : index
    %c64_159 = arith.constant 64 : index
    %336 = vector.load %arg7[%c0_158, %c64_159] : memref<8x96xf32, #tpu.memory_space<vmem>>, vector<8x32xf32>
    tpu.vector_store %arg7[%c0_158, %c64_159], %334 {strides = array<i32>} : memref<8x96xf32, #tpu.memory_space<vmem>>, vector<8x32xf32>,
    %337 = arith.index_cast %c4_i32 : i32 to index
    %c0_160 = arith.constant 0 : index
    %c32_161 = arith.constant 32 : index
    %338 = vector.load %arg5[%337, %c0_160, %c32_161] : memref<8x8x128xf32, #tpu.memory_space<vmem>>, vector<1x8x32xf32>
    %339 = vector.shape_cast %338 : vector<1x8x32xf32> to vector<8x32xf32>
    %340 = vector.shape_cast %334 : vector<8x32xf32> to vector<1x8x32xf32>
    tpu.vector_store %arg5[%337, %c0_160, %c32_161], %340 {strides = array<i32>} : memref<8x8x128xf32, #tpu.memory_space<vmem>>, vector<1x8x32xf32>,
    %341 = arith.index_cast %c4_i32 : i32 to index
    %c0_162 = arith.constant 0 : index
    %c96_163 = arith.constant 96 : index
    %342 = vector.load %arg5[%341, %c0_162, %c96_163] : memref<8x8x128xf32, #tpu.memory_space<vmem>>, vector<1x8x32xf32>
    %343 = vector.shape_cast %342 : vector<1x8x32xf32> to vector<8x32xf32>
    %344 = vector.shape_cast %331 : vector<8x32xf32> to vector<1x8x32xf32>
    tpu.vector_store %arg5[%341, %c0_162, %c96_163], %344 {strides = array<i32>} : memref<8x8x128xf32, #tpu.memory_space<vmem>>, vector<1x8x32xf32>,
    %c5_i32 = arith.constant 5 : i32
    %c8_i32_164 = arith.constant 8 : i32
    %345 = arith.muli %c5_i32, %c8_i32_164 : i32
    %346 = tpu.assume_multiple %345, 8 : i32
    %347 = arith.index_cast %346 : i32 to index
    %c0_165 = arith.constant 0 : index
    %348 = vector.load %arg6[%347, %c0_165] : memref<64x256xf32, #tpu.memory_space<vmem>>, vector<8x256xf32>
    %c0_166 = arith.constant 0 : index
    %c0_167 = arith.constant 0 : index
    %349 = vector.load %arg7[%c0_166, %c0_167] : memref<8x96xf32, #tpu.memory_space<vmem>>, vector<8x64xf32>
    %350 = vector.extract_strided_slice %348 {offsets = [0, 0], sizes = [8, 128], strides = [1, 1]} : vector<8x256xf32> to vector<8x128xf32>
    %cst_168 = arith.constant dense<0.000000e+00> : vector<8x128xf32>
    %351 = tpu.matmul %349, %12, %cst_168 {dimension_numbers = #tpu.dot_dimension_numbers<[1], [0], [0], [1], [0, 0, 1, 1], [], []>} : vector<8x64xf32>, vector<64x128xf32>, vector<8x128xf32> -> vector<8x128xf32>
    %352 = arith.addf %350, %351 : vector<8x128xf32>
    %353 = vector.extract_strided_slice %352 {offsets = [0, 0], sizes = [8, 96], strides = [1, 1]} : vector<8x128xf32> to vector<8x96xf32>
    %354 = arith.negf %353 : vector<8x96xf32>
    %355 = math.exp %354 : vector<8x96xf32>
    %cst_169 = arith.constant 1.000000e+00 : f32
    %356 = vector.broadcast %cst_169 : f32 to vector<8x96xf32>
    %357 = arith.addf %356, %355 : vector<8x96xf32>
    %358 = arith.divf %356, %357 : vector<8x96xf32>
    %359 = vector.extract_strided_slice %352 {offsets = [0, 96], sizes = [8, 32], strides = [1, 1]} : vector<8x128xf32> to vector<8x32xf32>
    %360 = math.tanh %359 : vector<8x32xf32>
    %c0_170 = arith.constant 0 : index
    %c0_171 = arith.constant 0 : index
    %361 = vector.load %arg8[%c0_170, %c0_171] : memref<8x64xf32, #tpu.memory_space<vmem>>, vector<8x32xf32>
    %362 = vector.extract_strided_slice %358 {offsets = [0, 0], sizes = [8, 32], strides = [1, 1]} : vector<8x96xf32> to vector<8x32xf32>
    %363 = arith.mulf %361, %362 : vector<8x32xf32>
    %364 = vector.extract_strided_slice %358 {offsets = [0, 32], sizes = [8, 32], strides = [1, 1]} : vector<8x96xf32> to vector<8x32xf32>
    %365 = arith.mulf %364, %360 : vector<8x32xf32>
    %366 = arith.addf %363, %365 : vector<8x32xf32>
    %367 = vector.extract_strided_slice %358 {offsets = [0, 64], sizes = [8, 32], strides = [1, 1]} : vector<8x96xf32> to vector<8x32xf32>
    %368 = math.tanh %366 : vector<8x32xf32>
    %369 = arith.mulf %367, %368 : vector<8x32xf32>
    %c0_172 = arith.constant 0 : index
    %c0_173 = arith.constant 0 : index
    %370 = vector.load %arg8[%c0_172, %c0_173] : memref<8x64xf32, #tpu.memory_space<vmem>>, vector<8x32xf32>
    tpu.vector_store %arg8[%c0_172, %c0_173], %366 {strides = array<i32>} : memref<8x64xf32, #tpu.memory_space<vmem>>, vector<8x32xf32>,
    %c0_174 = arith.constant 0 : index
    %c32_175 = arith.constant 32 : index
    %371 = vector.load %arg7[%c0_174, %c32_175] : memref<8x96xf32, #tpu.memory_space<vmem>>, vector<8x32xf32>
    tpu.vector_store %arg7[%c0_174, %c32_175], %369 {strides = array<i32>} : memref<8x96xf32, #tpu.memory_space<vmem>>, vector<8x32xf32>,
    %372 = arith.index_cast %c5_i32 : i32 to index
    %c0_176 = arith.constant 0 : index
    %c0_177 = arith.constant 0 : index
    %373 = vector.load %arg5[%372, %c0_176, %c0_177] : memref<8x8x128xf32, #tpu.memory_space<vmem>>, vector<1x8x32xf32>
    %374 = vector.shape_cast %373 : vector<1x8x32xf32> to vector<8x32xf32>
    %375 = vector.shape_cast %369 : vector<8x32xf32> to vector<1x8x32xf32>
    tpu.vector_store %arg5[%372, %c0_176, %c0_177], %375 {strides = array<i32>} : memref<8x8x128xf32, #tpu.memory_space<vmem>>, vector<1x8x32xf32>,
    %376 = arith.index_cast %c5_i32 : i32 to index
    %c0_178 = arith.constant 0 : index
    %c64_179 = arith.constant 64 : index
    %377 = vector.load %arg5[%376, %c0_178, %c64_179] : memref<8x8x128xf32, #tpu.memory_space<vmem>>, vector<1x8x32xf32>
    %378 = vector.shape_cast %377 : vector<1x8x32xf32> to vector<8x32xf32>
    %379 = vector.shape_cast %366 : vector<8x32xf32> to vector<1x8x32xf32>
    tpu.vector_store %arg5[%376, %c0_178, %c64_179], %379 {strides = array<i32>} : memref<8x8x128xf32, #tpu.memory_space<vmem>>, vector<1x8x32xf32>,
    %c0_180 = arith.constant 0 : index
    %c32_181 = arith.constant 32 : index
    %380 = vector.load %arg7[%c0_180, %c32_181] : memref<8x96xf32, #tpu.memory_space<vmem>>, vector<8x64xf32>
    %381 = vector.extract_strided_slice %348 {offsets = [0, 128], sizes = [8, 128], strides = [1, 1]} : vector<8x256xf32> to vector<8x128xf32>
    %cst_182 = arith.constant dense<0.000000e+00> : vector<8x128xf32>
    %382 = tpu.matmul %380, %14, %cst_182 {dimension_numbers = #tpu.dot_dimension_numbers<[1], [0], [0], [1], [0, 0, 1, 1], [], []>} : vector<8x64xf32>, vector<64x128xf32>, vector<8x128xf32> -> vector<8x128xf32>
    %383 = arith.addf %381, %382 : vector<8x128xf32>
    %384 = vector.extract_strided_slice %383 {offsets = [0, 0], sizes = [8, 96], strides = [1, 1]} : vector<8x128xf32> to vector<8x96xf32>
    %385 = arith.negf %384 : vector<8x96xf32>
    %386 = math.exp %385 : vector<8x96xf32>
    %cst_183 = arith.constant 1.000000e+00 : f32
    %387 = vector.broadcast %cst_183 : f32 to vector<8x96xf32>
    %388 = arith.addf %387, %386 : vector<8x96xf32>
    %389 = arith.divf %387, %388 : vector<8x96xf32>
    %390 = vector.extract_strided_slice %383 {offsets = [0, 96], sizes = [8, 32], strides = [1, 1]} : vector<8x128xf32> to vector<8x32xf32>
    %391 = math.tanh %390 : vector<8x32xf32>
    %c0_184 = arith.constant 0 : index
    %c32_185 = arith.constant 32 : index
    %392 = vector.load %arg8[%c0_184, %c32_185] : memref<8x64xf32, #tpu.memory_space<vmem>>, vector<8x32xf32>
    %393 = vector.extract_strided_slice %389 {offsets = [0, 0], sizes = [8, 32], strides = [1, 1]} : vector<8x96xf32> to vector<8x32xf32>
    %394 = arith.mulf %392, %393 : vector<8x32xf32>
    %395 = vector.extract_strided_slice %389 {offsets = [0, 32], sizes = [8, 32], strides = [1, 1]} : vector<8x96xf32> to vector<8x32xf32>
    %396 = arith.mulf %395, %391 : vector<8x32xf32>
    %397 = arith.addf %394, %396 : vector<8x32xf32>
    %398 = vector.extract_strided_slice %389 {offsets = [0, 64], sizes = [8, 32], strides = [1, 1]} : vector<8x96xf32> to vector<8x32xf32>
    %399 = math.tanh %397 : vector<8x32xf32>
    %400 = arith.mulf %398, %399 : vector<8x32xf32>
    %c0_186 = arith.constant 0 : index
    %c32_187 = arith.constant 32 : index
    %401 = vector.load %arg8[%c0_186, %c32_187] : memref<8x64xf32, #tpu.memory_space<vmem>>, vector<8x32xf32>
    tpu.vector_store %arg8[%c0_186, %c32_187], %397 {strides = array<i32>} : memref<8x64xf32, #tpu.memory_space<vmem>>, vector<8x32xf32>,
    %c0_188 = arith.constant 0 : index
    %c64_189 = arith.constant 64 : index
    %402 = vector.load %arg7[%c0_188, %c64_189] : memref<8x96xf32, #tpu.memory_space<vmem>>, vector<8x32xf32>
    tpu.vector_store %arg7[%c0_188, %c64_189], %400 {strides = array<i32>} : memref<8x96xf32, #tpu.memory_space<vmem>>, vector<8x32xf32>,
    %403 = arith.index_cast %c5_i32 : i32 to index
    %c0_190 = arith.constant 0 : index
    %c32_191 = arith.constant 32 : index
    %404 = vector.load %arg5[%403, %c0_190, %c32_191] : memref<8x8x128xf32, #tpu.memory_space<vmem>>, vector<1x8x32xf32>
    %405 = vector.shape_cast %404 : vector<1x8x32xf32> to vector<8x32xf32>
    %406 = vector.shape_cast %400 : vector<8x32xf32> to vector<1x8x32xf32>
    tpu.vector_store %arg5[%403, %c0_190, %c32_191], %406 {strides = array<i32>} : memref<8x8x128xf32, #tpu.memory_space<vmem>>, vector<1x8x32xf32>,
    %407 = arith.index_cast %c5_i32 : i32 to index
    %c0_192 = arith.constant 0 : index
    %c96_193 = arith.constant 96 : index
    %408 = vector.load %arg5[%407, %c0_192, %c96_193] : memref<8x8x128xf32, #tpu.memory_space<vmem>>, vector<1x8x32xf32>
    %409 = vector.shape_cast %408 : vector<1x8x32xf32> to vector<8x32xf32>
    %410 = vector.shape_cast %397 : vector<8x32xf32> to vector<1x8x32xf32>
    tpu.vector_store %arg5[%407, %c0_192, %c96_193], %410 {strides = array<i32>} : memref<8x8x128xf32, #tpu.memory_space<vmem>>, vector<1x8x32xf32>,
    %c6_i32 = arith.constant 6 : i32
    %c8_i32_194 = arith.constant 8 : i32
    %411 = arith.muli %c6_i32, %c8_i32_194 : i32
    %412 = tpu.assume_multiple %411, 8 : i32
    %413 = arith.index_cast %412 : i32 to index
    %c0_195 = arith.constant 0 : index
    %414 = vector.load %arg6[%413, %c0_195] : memref<64x256xf32, #tpu.memory_space<vmem>>, vector<8x256xf32>
    %c0_196 = arith.constant 0 : index
    %c0_197 = arith.constant 0 : index
    %415 = vector.load %arg7[%c0_196, %c0_197] : memref<8x96xf32, #tpu.memory_space<vmem>>, vector<8x64xf32>
    %416 = vector.extract_strided_slice %414 {offsets = [0, 0], sizes = [8, 128], strides = [1, 1]} : vector<8x256xf32> to vector<8x128xf32>
    %cst_198 = arith.constant dense<0.000000e+00> : vector<8x128xf32>
    %417 = tpu.matmul %415, %12, %cst_198 {dimension_numbers = #tpu.dot_dimension_numbers<[1], [0], [0], [1], [0, 0, 1, 1], [], []>} : vector<8x64xf32>, vector<64x128xf32>, vector<8x128xf32> -> vector<8x128xf32>
    %418 = arith.addf %416, %417 : vector<8x128xf32>
    %419 = vector.extract_strided_slice %418 {offsets = [0, 0], sizes = [8, 96], strides = [1, 1]} : vector<8x128xf32> to vector<8x96xf32>
    %420 = arith.negf %419 : vector<8x96xf32>
    %421 = math.exp %420 : vector<8x96xf32>
    %cst_199 = arith.constant 1.000000e+00 : f32
    %422 = vector.broadcast %cst_199 : f32 to vector<8x96xf32>
    %423 = arith.addf %422, %421 : vector<8x96xf32>
    %424 = arith.divf %422, %423 : vector<8x96xf32>
    %425 = vector.extract_strided_slice %418 {offsets = [0, 96], sizes = [8, 32], strides = [1, 1]} : vector<8x128xf32> to vector<8x32xf32>
    %426 = math.tanh %425 : vector<8x32xf32>
    %c0_200 = arith.constant 0 : index
    %c0_201 = arith.constant 0 : index
    %427 = vector.load %arg8[%c0_200, %c0_201] : memref<8x64xf32, #tpu.memory_space<vmem>>, vector<8x32xf32>
    %428 = vector.extract_strided_slice %424 {offsets = [0, 0], sizes = [8, 32], strides = [1, 1]} : vector<8x96xf32> to vector<8x32xf32>
    %429 = arith.mulf %427, %428 : vector<8x32xf32>
    %430 = vector.extract_strided_slice %424 {offsets = [0, 32], sizes = [8, 32], strides = [1, 1]} : vector<8x96xf32> to vector<8x32xf32>
    %431 = arith.mulf %430, %426 : vector<8x32xf32>
    %432 = arith.addf %429, %431 : vector<8x32xf32>
    %433 = vector.extract_strided_slice %424 {offsets = [0, 64], sizes = [8, 32], strides = [1, 1]} : vector<8x96xf32> to vector<8x32xf32>
    %434 = math.tanh %432 : vector<8x32xf32>
    %435 = arith.mulf %433, %434 : vector<8x32xf32>
    %c0_202 = arith.constant 0 : index
    %c0_203 = arith.constant 0 : index
    %436 = vector.load %arg8[%c0_202, %c0_203] : memref<8x64xf32, #tpu.memory_space<vmem>>, vector<8x32xf32>
    tpu.vector_store %arg8[%c0_202, %c0_203], %432 {strides = array<i32>} : memref<8x64xf32, #tpu.memory_space<vmem>>, vector<8x32xf32>,
    %c0_204 = arith.constant 0 : index
    %c32_205 = arith.constant 32 : index
    %437 = vector.load %arg7[%c0_204, %c32_205] : memref<8x96xf32, #tpu.memory_space<vmem>>, vector<8x32xf32>
    tpu.vector_store %arg7[%c0_204, %c32_205], %435 {strides = array<i32>} : memref<8x96xf32, #tpu.memory_space<vmem>>, vector<8x32xf32>,
    %438 = arith.index_cast %c6_i32 : i32 to index
    %c0_206 = arith.constant 0 : index
    %c0_207 = arith.constant 0 : index
    %439 = vector.load %arg5[%438, %c0_206, %c0_207] : memref<8x8x128xf32, #tpu.memory_space<vmem>>, vector<1x8x32xf32>
    %440 = vector.shape_cast %439 : vector<1x8x32xf32> to vector<8x32xf32>
    %441 = vector.shape_cast %435 : vector<8x32xf32> to vector<1x8x32xf32>
    tpu.vector_store %arg5[%438, %c0_206, %c0_207], %441 {strides = array<i32>} : memref<8x8x128xf32, #tpu.memory_space<vmem>>, vector<1x8x32xf32>,
    %442 = arith.index_cast %c6_i32 : i32 to index
    %c0_208 = arith.constant 0 : index
    %c64_209 = arith.constant 64 : index
    %443 = vector.load %arg5[%442, %c0_208, %c64_209] : memref<8x8x128xf32, #tpu.memory_space<vmem>>, vector<1x8x32xf32>
    %444 = vector.shape_cast %443 : vector<1x8x32xf32> to vector<8x32xf32>
    %445 = vector.shape_cast %432 : vector<8x32xf32> to vector<1x8x32xf32>
    tpu.vector_store %arg5[%442, %c0_208, %c64_209], %445 {strides = array<i32>} : memref<8x8x128xf32, #tpu.memory_space<vmem>>, vector<1x8x32xf32>,
    %c0_210 = arith.constant 0 : index
    %c32_211 = arith.constant 32 : index
    %446 = vector.load %arg7[%c0_210, %c32_211] : memref<8x96xf32, #tpu.memory_space<vmem>>, vector<8x64xf32>
    %447 = vector.extract_strided_slice %414 {offsets = [0, 128], sizes = [8, 128], strides = [1, 1]} : vector<8x256xf32> to vector<8x128xf32>
    %cst_212 = arith.constant dense<0.000000e+00> : vector<8x128xf32>
    %448 = tpu.matmul %446, %14, %cst_212 {dimension_numbers = #tpu.dot_dimension_numbers<[1], [0], [0], [1], [0, 0, 1, 1], [], []>} : vector<8x64xf32>, vector<64x128xf32>, vector<8x128xf32> -> vector<8x128xf32>
    %449 = arith.addf %447, %448 : vector<8x128xf32>
    %450 = vector.extract_strided_slice %449 {offsets = [0, 0], sizes = [8, 96], strides = [1, 1]} : vector<8x128xf32> to vector<8x96xf32>
    %451 = arith.negf %450 : vector<8x96xf32>
    %452 = math.exp %451 : vector<8x96xf32>
    %cst_213 = arith.constant 1.000000e+00 : f32
    %453 = vector.broadcast %cst_213 : f32 to vector<8x96xf32>
    %454 = arith.addf %453, %452 : vector<8x96xf32>
    %455 = arith.divf %453, %454 : vector<8x96xf32>
    %456 = vector.extract_strided_slice %449 {offsets = [0, 96], sizes = [8, 32], strides = [1, 1]} : vector<8x128xf32> to vector<8x32xf32>
    %457 = math.tanh %456 : vector<8x32xf32>
    %c0_214 = arith.constant 0 : index
    %c32_215 = arith.constant 32 : index
    %458 = vector.load %arg8[%c0_214, %c32_215] : memref<8x64xf32, #tpu.memory_space<vmem>>, vector<8x32xf32>
    %459 = vector.extract_strided_slice %455 {offsets = [0, 0], sizes = [8, 32], strides = [1, 1]} : vector<8x96xf32> to vector<8x32xf32>
    %460 = arith.mulf %458, %459 : vector<8x32xf32>
    %461 = vector.extract_strided_slice %455 {offsets = [0, 32], sizes = [8, 32], strides = [1, 1]} : vector<8x96xf32> to vector<8x32xf32>
    %462 = arith.mulf %461, %457 : vector<8x32xf32>
    %463 = arith.addf %460, %462 : vector<8x32xf32>
    %464 = vector.extract_strided_slice %455 {offsets = [0, 64], sizes = [8, 32], strides = [1, 1]} : vector<8x96xf32> to vector<8x32xf32>
    %465 = math.tanh %463 : vector<8x32xf32>
    %466 = arith.mulf %464, %465 : vector<8x32xf32>
    %c0_216 = arith.constant 0 : index
    %c32_217 = arith.constant 32 : index
    %467 = vector.load %arg8[%c0_216, %c32_217] : memref<8x64xf32, #tpu.memory_space<vmem>>, vector<8x32xf32>
    tpu.vector_store %arg8[%c0_216, %c32_217], %463 {strides = array<i32>} : memref<8x64xf32, #tpu.memory_space<vmem>>, vector<8x32xf32>,
    %c0_218 = arith.constant 0 : index
    %c64_219 = arith.constant 64 : index
    %468 = vector.load %arg7[%c0_218, %c64_219] : memref<8x96xf32, #tpu.memory_space<vmem>>, vector<8x32xf32>
    tpu.vector_store %arg7[%c0_218, %c64_219], %466 {strides = array<i32>} : memref<8x96xf32, #tpu.memory_space<vmem>>, vector<8x32xf32>,
    %469 = arith.index_cast %c6_i32 : i32 to index
    %c0_220 = arith.constant 0 : index
    %c32_221 = arith.constant 32 : index
    %470 = vector.load %arg5[%469, %c0_220, %c32_221] : memref<8x8x128xf32, #tpu.memory_space<vmem>>, vector<1x8x32xf32>
    %471 = vector.shape_cast %470 : vector<1x8x32xf32> to vector<8x32xf32>
    %472 = vector.shape_cast %466 : vector<8x32xf32> to vector<1x8x32xf32>
    tpu.vector_store %arg5[%469, %c0_220, %c32_221], %472 {strides = array<i32>} : memref<8x8x128xf32, #tpu.memory_space<vmem>>, vector<1x8x32xf32>,
    %473 = arith.index_cast %c6_i32 : i32 to index
    %c0_222 = arith.constant 0 : index
    %c96_223 = arith.constant 96 : index
    %474 = vector.load %arg5[%473, %c0_222, %c96_223] : memref<8x8x128xf32, #tpu.memory_space<vmem>>, vector<1x8x32xf32>
    %475 = vector.shape_cast %474 : vector<1x8x32xf32> to vector<8x32xf32>
    %476 = vector.shape_cast %463 : vector<8x32xf32> to vector<1x8x32xf32>
    tpu.vector_store %arg5[%473, %c0_222, %c96_223], %476 {strides = array<i32>} : memref<8x8x128xf32, #tpu.memory_space<vmem>>, vector<1x8x32xf32>,
    %c7_i32 = arith.constant 7 : i32
    %c8_i32_224 = arith.constant 8 : i32
    %477 = arith.muli %c7_i32, %c8_i32_224 : i32
    %478 = tpu.assume_multiple %477, 8 : i32
    %479 = arith.index_cast %478 : i32 to index
    %c0_225 = arith.constant 0 : index
    %480 = vector.load %arg6[%479, %c0_225] : memref<64x256xf32, #tpu.memory_space<vmem>>, vector<8x256xf32>
    %c0_226 = arith.constant 0 : index
    %c0_227 = arith.constant 0 : index
    %481 = vector.load %arg7[%c0_226, %c0_227] : memref<8x96xf32, #tpu.memory_space<vmem>>, vector<8x64xf32>
    %482 = vector.extract_strided_slice %480 {offsets = [0, 0], sizes = [8, 128], strides = [1, 1]} : vector<8x256xf32> to vector<8x128xf32>
    %cst_228 = arith.constant dense<0.000000e+00> : vector<8x128xf32>
    %483 = tpu.matmul %481, %12, %cst_228 {dimension_numbers = #tpu.dot_dimension_numbers<[1], [0], [0], [1], [0, 0, 1, 1], [], []>} : vector<8x64xf32>, vector<64x128xf32>, vector<8x128xf32> -> vector<8x128xf32>
    %484 = arith.addf %482, %483 : vector<8x128xf32>
    %485 = vector.extract_strided_slice %484 {offsets = [0, 0], sizes = [8, 96], strides = [1, 1]} : vector<8x128xf32> to vector<8x96xf32>
    %486 = arith.negf %485 : vector<8x96xf32>
    %487 = math.exp %486 : vector<8x96xf32>
    %cst_229 = arith.constant 1.000000e+00 : f32
    %488 = vector.broadcast %cst_229 : f32 to vector<8x96xf32>
    %489 = arith.addf %488, %487 : vector<8x96xf32>
    %490 = arith.divf %488, %489 : vector<8x96xf32>
    %491 = vector.extract_strided_slice %484 {offsets = [0, 96], sizes = [8, 32], strides = [1, 1]} : vector<8x128xf32> to vector<8x32xf32>
    %492 = math.tanh %491 : vector<8x32xf32>
    %c0_230 = arith.constant 0 : index
    %c0_231 = arith.constant 0 : index
    %493 = vector.load %arg8[%c0_230, %c0_231] : memref<8x64xf32, #tpu.memory_space<vmem>>, vector<8x32xf32>
    %494 = vector.extract_strided_slice %490 {offsets = [0, 0], sizes = [8, 32], strides = [1, 1]} : vector<8x96xf32> to vector<8x32xf32>
    %495 = arith.mulf %493, %494 : vector<8x32xf32>
    %496 = vector.extract_strided_slice %490 {offsets = [0, 32], sizes = [8, 32], strides = [1, 1]} : vector<8x96xf32> to vector<8x32xf32>
    %497 = arith.mulf %496, %492 : vector<8x32xf32>
    %498 = arith.addf %495, %497 : vector<8x32xf32>
    %499 = vector.extract_strided_slice %490 {offsets = [0, 64], sizes = [8, 32], strides = [1, 1]} : vector<8x96xf32> to vector<8x32xf32>
    %500 = math.tanh %498 : vector<8x32xf32>
    %501 = arith.mulf %499, %500 : vector<8x32xf32>
    %c0_232 = arith.constant 0 : index
    %c0_233 = arith.constant 0 : index
    %502 = vector.load %arg8[%c0_232, %c0_233] : memref<8x64xf32, #tpu.memory_space<vmem>>, vector<8x32xf32>
    tpu.vector_store %arg8[%c0_232, %c0_233], %498 {strides = array<i32>} : memref<8x64xf32, #tpu.memory_space<vmem>>, vector<8x32xf32>,
    %c0_234 = arith.constant 0 : index
    %c32_235 = arith.constant 32 : index
    %503 = vector.load %arg7[%c0_234, %c32_235] : memref<8x96xf32, #tpu.memory_space<vmem>>, vector<8x32xf32>
    tpu.vector_store %arg7[%c0_234, %c32_235], %501 {strides = array<i32>} : memref<8x96xf32, #tpu.memory_space<vmem>>, vector<8x32xf32>,
    %504 = arith.index_cast %c7_i32 : i32 to index
    %c0_236 = arith.constant 0 : index
    %c0_237 = arith.constant 0 : index
    %505 = vector.load %arg5[%504, %c0_236, %c0_237] : memref<8x8x128xf32, #tpu.memory_space<vmem>>, vector<1x8x32xf32>
    %506 = vector.shape_cast %505 : vector<1x8x32xf32> to vector<8x32xf32>
    %507 = vector.shape_cast %501 : vector<8x32xf32> to vector<1x8x32xf32>
    tpu.vector_store %arg5[%504, %c0_236, %c0_237], %507 {strides = array<i32>} : memref<8x8x128xf32, #tpu.memory_space<vmem>>, vector<1x8x32xf32>,
    %508 = arith.index_cast %c7_i32 : i32 to index
    %c0_238 = arith.constant 0 : index
    %c64_239 = arith.constant 64 : index
    %509 = vector.load %arg5[%508, %c0_238, %c64_239] : memref<8x8x128xf32, #tpu.memory_space<vmem>>, vector<1x8x32xf32>
    %510 = vector.shape_cast %509 : vector<1x8x32xf32> to vector<8x32xf32>
    %511 = vector.shape_cast %498 : vector<8x32xf32> to vector<1x8x32xf32>
    tpu.vector_store %arg5[%508, %c0_238, %c64_239], %511 {strides = array<i32>} : memref<8x8x128xf32, #tpu.memory_space<vmem>>, vector<1x8x32xf32>,
    %c0_240 = arith.constant 0 : index
    %c32_241 = arith.constant 32 : index
    %512 = vector.load %arg7[%c0_240, %c32_241] : memref<8x96xf32, #tpu.memory_space<vmem>>, vector<8x64xf32>
    %513 = vector.extract_strided_slice %480 {offsets = [0, 128], sizes = [8, 128], strides = [1, 1]} : vector<8x256xf32> to vector<8x128xf32>
    %cst_242 = arith.constant dense<0.000000e+00> : vector<8x128xf32>
    %514 = tpu.matmul %512, %14, %cst_242 {dimension_numbers = #tpu.dot_dimension_numbers<[1], [0], [0], [1], [0, 0, 1, 1], [], []>} : vector<8x64xf32>, vector<64x128xf32>, vector<8x128xf32> -> vector<8x128xf32>
    %515 = arith.addf %513, %514 : vector<8x128xf32>
    %516 = vector.extract_strided_slice %515 {offsets = [0, 0], sizes = [8, 96], strides = [1, 1]} : vector<8x128xf32> to vector<8x96xf32>
    %517 = arith.negf %516 : vector<8x96xf32>
    %518 = math.exp %517 : vector<8x96xf32>
    %cst_243 = arith.constant 1.000000e+00 : f32
    %519 = vector.broadcast %cst_243 : f32 to vector<8x96xf32>
    %520 = arith.addf %519, %518 : vector<8x96xf32>
    %521 = arith.divf %519, %520 : vector<8x96xf32>
    %522 = vector.extract_strided_slice %515 {offsets = [0, 96], sizes = [8, 32], strides = [1, 1]} : vector<8x128xf32> to vector<8x32xf32>
    %523 = math.tanh %522 : vector<8x32xf32>
    %c0_244 = arith.constant 0 : index
    %c32_245 = arith.constant 32 : index
    %524 = vector.load %arg8[%c0_244, %c32_245] : memref<8x64xf32, #tpu.memory_space<vmem>>, vector<8x32xf32>
    %525 = vector.extract_strided_slice %521 {offsets = [0, 0], sizes = [8, 32], strides = [1, 1]} : vector<8x96xf32> to vector<8x32xf32>
    %526 = arith.mulf %524, %525 : vector<8x32xf32>
    %527 = vector.extract_strided_slice %521 {offsets = [0, 32], sizes = [8, 32], strides = [1, 1]} : vector<8x96xf32> to vector<8x32xf32>
    %528 = arith.mulf %527, %523 : vector<8x32xf32>
    %529 = arith.addf %526, %528 : vector<8x32xf32>
    %530 = vector.extract_strided_slice %521 {offsets = [0, 64], sizes = [8, 32], strides = [1, 1]} : vector<8x96xf32> to vector<8x32xf32>
    %531 = math.tanh %529 : vector<8x32xf32>
    %532 = arith.mulf %530, %531 : vector<8x32xf32>
    %c0_246 = arith.constant 0 : index
    %c32_247 = arith.constant 32 : index
    %533 = vector.load %arg8[%c0_246, %c32_247] : memref<8x64xf32, #tpu.memory_space<vmem>>, vector<8x32xf32>
    tpu.vector_store %arg8[%c0_246, %c32_247], %529 {strides = array<i32>} : memref<8x64xf32, #tpu.memory_space<vmem>>, vector<8x32xf32>,
    %c0_248 = arith.constant 0 : index
    %c64_249 = arith.constant 64 : index
    %534 = vector.load %arg7[%c0_248, %c64_249] : memref<8x96xf32, #tpu.memory_space<vmem>>, vector<8x32xf32>
    tpu.vector_store %arg7[%c0_248, %c64_249], %532 {strides = array<i32>} : memref<8x96xf32, #tpu.memory_space<vmem>>, vector<8x32xf32>,
    %535 = arith.index_cast %c7_i32 : i32 to index
    %c0_250 = arith.constant 0 : index
    %c32_251 = arith.constant 32 : index
    %536 = vector.load %arg5[%535, %c0_250, %c32_251] : memref<8x8x128xf32, #tpu.memory_space<vmem>>, vector<1x8x32xf32>
    %537 = vector.shape_cast %536 : vector<1x8x32xf32> to vector<8x32xf32>
    %538 = vector.shape_cast %532 : vector<8x32xf32> to vector<1x8x32xf32>
    tpu.vector_store %arg5[%535, %c0_250, %c32_251], %538 {strides = array<i32>} : memref<8x8x128xf32, #tpu.memory_space<vmem>>, vector<1x8x32xf32>,
    %539 = arith.index_cast %c7_i32 : i32 to index
    %c0_252 = arith.constant 0 : index
    %c96_253 = arith.constant 96 : index
    %540 = vector.load %arg5[%539, %c0_252, %c96_253] : memref<8x8x128xf32, #tpu.memory_space<vmem>>, vector<1x8x32xf32>
    %541 = vector.shape_cast %540 : vector<1x8x32xf32> to vector<8x32xf32>
    %542 = vector.shape_cast %529 : vector<8x32xf32> to vector<1x8x32xf32>
    tpu.vector_store %arg5[%539, %c0_252, %c96_253], %542 {strides = array<i32>} : memref<8x8x128xf32, #tpu.memory_space<vmem>>, vector<1x8x32xf32>,
    %c8_i32_254 = arith.constant 8 : i32
    return
  }
  func.func @transform_0(%arg0: i32) -> (i32, i32) {
    %c0_i32 = arith.constant 0 : i32
    %c0_i32_0 = arith.constant 0 : i32
    %c0_i32_1 = arith.constant 0 : i32
    return %c0_i32, %c0_i32_0 : i32, i32
  }
  func.func @transform_1(%arg0: i32) -> (i32, i32) {
    %c0_i32 = arith.constant 0 : i32
    %c0_i32_0 = arith.constant 0 : i32
    %c0_i32_1 = arith.constant 0 : i32
    return %c0_i32, %c0_i32_0 : i32, i32
  }
  func.func @transform_2(%arg0: i32) -> (i32, i32) {
    %c0_i32 = arith.constant 0 : i32
    %c0_i32_0 = arith.constant 0 : i32
    %c0_i32_1 = arith.constant 0 : i32
    return %c0_i32, %c0_i32_0 : i32, i32
  }
  func.func @transform_3(%arg0: i32) -> (i32, i32, i32) {
    %c0_i32 = arith.constant 0 : i32
    %c0_i32_0 = arith.constant 0 : i32
    %c0_i32_1 = arith.constant 0 : i32
    %c0_i32_2 = arith.constant 0 : i32
    return %c0_i32, %c0_i32_0, %c0_i32_1 : i32, i32, i32
  }
  func.func @transform_4(%arg0: i32) -> (i32, i32, i32) {
    %c0_i32 = arith.constant 0 : i32
    %c0_i32_0 = arith.constant 0 : i32
    %c0_i32_1 = arith.constant 0 : i32
    %c0_i32_2 = arith.constant 0 : i32
    return %c0_i32, %c0_i32_0, %c0_i32_1 : i32, i32, i32
  }
}

</mosaic_0001>

<bundles_post_ra>
// kernel: tpu_custom_call.1
= control target key start
LH: loop header
LB: loop body
LE: loop exit
PB: predicated region body
PF: predicated region fallthrough
CT: control target
= control target key end

     0   :  { %9 = vsyncpa [#allocation6], 0  ;;  %s3658_s0 = inlined_call_operand.vmem [shape: f32[64,16], index: 0, kind: input, shape index: {}]   ;;  %s3659_s1 = inlined_call_operand.vmem [shape: f32[16,256], index: 1, kind: input, shape index: {}]   ;;  %s3660_s2 = inlined_call_operand.vmem [shape: f32[1,256], index: 2, kind: input, shape index: {}]   ;;  %s3661_s3 = inlined_call_operand.hbm [shape: f32[2,64,128], index: 3, kind: input, shape index: {}]   ;;  %s3662_s4 = inlined_call_operand.hbm [shape: f32[8,8,128], index: 4, kind: output, shape index: {}]  }
   0x1   :  { %10 = vsyncpa [#allocation7], 0  ;;  %s2823_s15 = smov [#allocation5]  }
   0x2   :  { %s22_s16 = sshll.u32 %s2823_s15, 4  ;;  %s23_s16 = int_to_ptr.vmem [resolvable:$true] %s22_s16 }
   0x3   :  { %s2787_s17 = scalar_lea.vmem %s23_s16, 2048  ;;  %p2792_p1 = scmp.lt.s32.totalorder %s23_s16, %s23_s16 }
   0x4   :  { %p2788_p0 = scmp.ne.s32.totalorder %s23_s16, %s2787_s17  ;;  %p2793_p2 = scmp.lt.s32.totalorder %s2787_s17, %s2787_s17 }
   0x6   :  { %p2794_p3 = por %p2793_p2, %p2792_p1 }
   0x8   :  { %p2795_p4 = pnand %p2794_p3, %p2788_p0 }
   0xa   :  { %2798 = shalt.err (!%p2795_p4)
}
   0xb   :  { %s2824_s18 = smov 128   ;;  %s2825_s19 = smov 8  }
   0xc   :  { %28 = dma.hbm_to_vmem [thread:$0]  %s3661_s3, 2048, %s23_s16, [#allocation6], %s2824_s18, %s2824_s18, %s2825_s19  }
   0xd   :  { %2819 = dma.done.wait [#allocation6], 2048  }
   0xe   :  { %2820 = vsyncadd [#allocation6], 4294965248  ;;  %vm210_vm0 = vcmask 785408   ;;  %v2826_v0 = vmov 0.0   ;;  %vm212_vm1 = vcmask 523264   ;;  %vm2827_vm2 = vmmov 0  }
   0xf   :  { %2322 = vmatprep.subr.mxu1 %v2826_v0  ;;  %145 = vmatprep.mubr.f32.mxu0 %v2826_v0  ;;  %211 = vst.msk [vmem:[#allocation3] sm:$0xff] %vm210_vm0, %v2826_v0  ;;  %v2870_v1 = vld [vmem:[#allocation5 + $0x38] sm:$0xff]  ;;  %v2872_v2 = vld [vmem:[#allocation5 + $0x30] sm:$0xff]  ;;  %v43_v3 = vld [vmem:[%s3659_s1 + $0x18] sm:$0xff]  ;;  %vm56_vm3 = vcmask 130048   ;;  %v46_v15 = vlaneseq  ;;  %s2828_s6 = smov 64  }
  0x10   :  { %2338 = vmatprep.mubr.msk.f32.mxu1 %vm2827_vm2, %v2826_v0  ;;  %213 = vst.msk [vmem:[#allocation4] sm:$0xff] %vm212_vm1, %v2826_v0  ;;  %2323 = vmatpush3.msra.mxu1 %v2870_v1  ;;  %v42_v4 = vld [vmem:[%s3659_s1 + $0x10] sm:$0xff]  ;;  %v2882_v5 = vld [vmem:[#allocation5 + $0x28] sm:$0xff]  ;;  %v41_v6 = vld [vmem:[%s3659_s1 + $0x8] sm:$0xff]  ;;  %vm336_vm4 = vcmask 261120   ;;  %vm342_vm5 = vcmask 523520  }
  0x11   :  { %2324 = vmatprep.subr.mxu1 %v2826_v0  ;;  %109 = vmatprep.subr.mxu0 %v43_v3  ;;  %v40_v7 = vld [vmem:[%s3659_s1] sm:$0xff]  ;;  %v2895_v9 = vld [vmem:[#allocation5 + $0x20] sm:$0xff]  ;;  %v2899_v10 = vld [vmem:[#allocation5 + $0x18] sm:$0xff]  ;;  %v2939_v16 = vshrl.u32 %v46_v15, 7  ;;  %s2830_s7 = smov 32   ;;  %vm352_vm6 = vcmask 785920  }
  0x12   :  { %2325 = vmatpush3.msra.mxu1 %v2872_v2  ;;  %110 = vmatpush1.msra.mxu0 %v42_v4  ;;  %v32_v8 = vld [vmem:[%s3658_s0] sm:$0xff]  ;;  %v2911_v12 = vld [vmem:[#allocation5 + $0x8] sm:$0xff]  ;;  %v2917_v13 = vld [vmem:[#allocation5] sm:$0xff]  ;;  %vm467_vm7 = vcmask 1048320  }
  0x13   :  { %2326 = vmatprep.subr.mxu1 %v2826_v0  ;;  %111 = vmatprep.subr.mxu0 %v41_v6  ;;  %v2905_v11 = vld [vmem:[#allocation5 + $0x10] sm:$0xff]  ;;  %v48_v17 = vsub.s32 0, %v2939_v16  ;;  %v2959_v37 = vld [vmem:[#allocation5 + $0x78] sm:$0xff]  ;;  %v2965_v40 = vld [vmem:[#allocation5 + $0x68] sm:$0xff]  ;;  %v52_v50 = vsub.s32 1, %v2939_v16 }
  0x14   :  { %2327 = vmatpush3.msra.mxu1 %v2882_v5  ;;  %112 = vmatpush1.msra.mxu0 %v40_v7  ;;  %v2945_v18 = vld [vmem:[%s3660_s2] sm:$0x3]  ;;  %s2829_s2 = smov 96   ;;  %v2971_v42 = vld [vmem:[#allocation5 + $0x60] sm:$0xff]  ;;  %v2977_v43 = vld [vmem:[#allocation5 + $0x58] sm:$0xff] }
  0x15   :  { %2328 = vmatprep.subr.mxu1 %v2826_v0  ;;  %2138 = vmatmul.mubr.msk.f32.vlgmr.msra.gmra.mxu0 %vm56_vm3, %v32_v8  ;;  %v2948_v19 = vrot.slane %v2945_v18, %v48_v17  ;;  %v2961_v38 = vld [vmem:[#allocation5 + $0x70] sm:$0xff]  ;;  %v2985_v45 = vld [vmem:[#allocation5 + $0x48] sm:$0xff]  ;;  %v2989_v46 = vld [vmem:[#allocation5 + $0x40] sm:$0xff]  ;;  %v3018_v51 = vrot.slane %v2945_v18, %v52_v50 }
  0x16   :  { %2329 = vmatpush3.msra.mxu1 %v2895_v9  ;;  %2360 = vmatprep.subr.mxu0 %v2826_v0  ;;  %v236_v14 = vld [vmem:[#allocation3] sm:$0xff]  ;;  %v33_v62 = vld [vmem:[%s3658_s0 + $0x8] sm:$0xff]  ;;  %v34_v63 = vld [vmem:[%s3658_s0 + $0x10] sm:$0xff] }
  0x17   :  { %2330 = vmatprep.subr.mxu1 %v2826_v0  ;;  %2361 = vmatpush3.msra.mxu0 %v2870_v1  ;;  %v318_v32 = vld [vmem:[#allocation4] sm:$0xff]  ;;  %v2981_v44 = vld [vmem:[#allocation5 + $0x50] sm:$0xff]  ;;  %v35_v3 = vld [vmem:[%s3658_s0 + $0x18] sm:$0xff] }
  0x18   :  { %2331 = vmatpush3.msra.mxu1 %v2899_v10  ;;  %151 = vmatprep.mubr.f32.mxu0 %v2826_v0  ;;  %v36_v4 = vld [vmem:[%s3658_s0 + $0x20] sm:$0xff]  ;;  %v37_v6 = vld [vmem:[%s3658_s0 + $0x28] sm:$0xff]  ;;  %v38_v18 = vld [vmem:[%s3658_s0 + $0x30] sm:$0xff] }
  0x19   :  { %2332 = vmatprep.subr.mxu1 %v2826_v0  ;;  %2362 = vmatprep.subr.mxu0 %v2826_v0 }
  0x1a   :  { %2333 = vmatpush3.msra.mxu1 %v2905_v11  ;;  %2363 = vmatpush3.msra.mxu0 %v2872_v2 }
  0x1b   :  { %2334 = vmatprep.subr.mxu1 %v2826_v0  ;;  %2364 = vmatprep.subr.mxu0 %v2826_v0 }
  0x1c   :  { %2335 = vmatpush3.msra.mxu1 %v2911_v12  ;;  %2365 = vmatpush3.msra.mxu0 %v2882_v5 }
  0x1d   :  { %2336 = vmatprep.subr.mxu1 %v2826_v0  ;;  %2366 = vmatprep.subr.mxu0 %v2826_v0 }
  0x1e   :  { %2337 = vmatpush3.msra.mxu1 %v2917_v13  ;;  %2367 = vmatpush3.msra.mxu0 %v2895_v9 }
  0x1f   :  { %2339 = vmatmul.mubr.msk.f32.vlgmr.msra.gmra.mxu1 %vm212_vm1, %v236_v14  ;;  %2341 = vmatprep.subr.mxu1 %v2826_v0 }
  0x20   :  { %2357 = vmatprep.mubr.msk.f32.mxu1 %vm2827_vm2, %v2826_v0  ;;  %2368 = vmatprep.subr.mxu0 %v2826_v0 }
  0x21   :  { %2369 = vmatpush3.msra.mxu0 %v2899_v10  ;;  %2342 = vmatpush3.msra.mxu1 %v2959_v37 }
  0x22   :  { %2370 = vmatprep.subr.mxu0 %v2826_v0  ;;  %2343 = vmatprep.subr.mxu1 %v2826_v0 }
  0x23   :  { %2371 = vmatpush3.msra.mxu0 %v2905_v11  ;;  %2344 = vmatpush3.msra.mxu1 %v2961_v38 }
  0x24   :  { %2372 = vmatprep.subr.mxu0 %v2826_v0  ;;  %2345 = vmatprep.subr.mxu1 %v2826_v0 }
  0x25   :  { %2373 = vmatpush3.msra.mxu0 %v2911_v12  ;;  %2346 = vmatpush3.msra.mxu1 %v2965_v40 }
  0x26   :  { %2374 = vmatprep.subr.mxu0 %v2826_v0  ;;  %2347 = vmatprep.subr.mxu1 %v2826_v0 }
  0x27   :  { %2375 = vmatpush3.msra.mxu0 %v2917_v13  ;;  %2348 = vmatpush3.msra.mxu1 %v2971_v42 }
  0x28   :  { %2398 = vmatprep.subr.mxu0 %v2826_v0  ;;  %2349 = vmatprep.subr.mxu1 %v2826_v0 }
  0x29   :  { %2350 = vmatpush3.msra.mxu1 %v2977_v43  ;;  %2139 = vmatmul.mubr.msk.f32.gmra.mxu0 %vm56_vm3, %v33_v62 }
  0x2a   :  { %2351 = vmatprep.subr.mxu1 %v2826_v0  ;;  %157 = vmatprep.mubr.f32.mxu0 %v2826_v0 }
  0x2b   :  { %2352 = vmatpush3.msra.mxu1 %v2981_v44 }
  0x2c   :  { %2353 = vmatprep.subr.mxu1 %v2826_v0 }
  0x2d   :  { %2354 = vmatpush3.msra.mxu1 %v2985_v45  ;;  %2140 = vmatmul.mubr.msk.f32.gmra.mxu0 %vm56_vm3, %v34_v63 }
  0x2e   :  { %2355 = vmatprep.subr.mxu1 %v2826_v0  ;;  %163 = vmatprep.mubr.f32.mxu0 %v2826_v0 }
  0x2f   :  { %2356 = vmatpush3.msra.mxu1 %v2989_v46 }
  0x30   :  { %2379 = vmatprep.subr.mxu1 %v2826_v0 }
  0x31   :  { %2141 = vmatmul.mubr.msk.f32.gmra.mxu0 %vm56_vm3, %v35_v3 }
  0x32   :  { %169 = vmatprep.mubr.f32.mxu0 %v2826_v0 }
  0x35   :  { %2142 = vmatmul.mubr.msk.f32.gmra.mxu0 %vm56_vm3, %v36_v4 }
  0x36   :  { %175 = vmatprep.mubr.f32.mxu0 %v2826_v0 }
  0x39   :  { %2143 = vmatmul.mubr.msk.f32.gmra.mxu0 %vm56_vm3, %v37_v6 }
  0x3a   :  { %181 = vmatprep.mubr.f32.mxu0 %v2826_v0 }
  0x3d   :  { %2144 = vmatmul.mubr.msk.f32.gmra.mxu0 %vm56_vm3, %v38_v18 }
  0x3e   :  { %187 = vmatprep.mubr.f32.mxu0 %v2826_v0 }
  0xd5   :  { %v147_v20 = vpop.f32.mrf.mxu0 }
  0xd6   :  { %v148_v21 = vadd.f32 %v147_v20, %v2948_v19  ;;  %v39_v20 = vld [vmem:[%s3658_s0 + $0x38] sm:$0xff]  ;;  %s2831_s0 = smov [#allocation8]  }
  0xd7   :  { %v149_v52 = vpop.f32.mrf.mxu0  ;;  %2145 = vmatmul.mubr.msk.f32.gmra.mxu0 %vm56_vm3, %v39_v20  ;;  %s2119_s23 = sshll.u32 %s2831_s0, 4  ;;  %s2120_s23 = int_to_ptr.vmem [resolvable:$true] %s2119_s23 }
  0xd8   :  { %v150_v53 = vadd.f32 %v149_v52, %v3018_v51  ;;  %2376 = vmatprep.mubr.msk.f32.mxu0 %vm2827_vm2, %v2826_v0  ;;  %s2799_s24 = scalar_lea.vmem %s2120_s23, 1024  ;;  %p2804_p6 = scmp.lt.s32.totalorder %s2120_s23, %s2120_s23 }
  0xd9   :  { %p2800_p5 = scmp.ne.s32.totalorder %s2120_s23, %s2799_s24  ;;  %p2805_p7 = scmp.lt.s32.totalorder %s2799_s24, %s2799_s24 }
  0xdb   :  { %p2806_p8 = por %p2805_p7, %p2804_p6 }
  0xdd   :  { %p2807_p9 = pnand %p2806_p8, %p2800_p5 }
  0xdf   :  { %v306_v22 = vpop.f32.mrf.mxu1 }
  0xe0   :  { %v310_v23 = vadd.f32 %v306_v22, %v148_v21 }
  0xe1   :  { %v2340_v24 = vpop.f32.mrf.mxu1 }
  0xe2   :  { %2635 = vtanh.f32 %v310_v23  ;;  %v2147_v26 = vmul.f32 -1.442695, %v310_v23 }
  0xe4   :  { %2637 = vpow2.f32 %v2147_v26 }
  0xef   :  { %v2636_v25 = vpop.eup %2635 }
  0xf0   :  { %321 = vrot.lane.b32.xlu0 %v2636_v25, %s2828_s6  ;;  %v153_v25 = vpop.f32.mrf.mxu0 }
  0xf1   :  { %v2638_v27 = vpop.eup %2637 }
  0xf2   :  { %v314_v28 = vadd.f32 1.0, %v2638_v27  ;;  %v3088_v26 = vpop.f32.mrf.mxu0 }
  0xf4   :  { %2639 = vrcp.f32 %v314_v28  ;;  %v3090_v27 = vpop.f32.mrf.mxu0 }
  0xf6   :  { %v3092_v28 = vpop.f32.mrf.mxu0 }
 0x101   :  { %v2640_v29 = vpop.eup %2639 }
 0x102   :  { %v319_v33 = vmul.f32 %v2640_v29, %v318_v32 }
 0x162   :  { %v322_v30 = vpop.permute.xlu0 %321 }
 0x163   :  { %v324_v31 = vmul.f32 %v2640_v29, %v322_v30 }
 0x165   :  { %326 = vrot.lane.b32.xlu0 %v324_v31, %s2829_s2 }
 0x1d7   :  { %v327_v34 = vpop.permute.xlu0 %326 }
 0x1d8   :  { %v2953_v35 = vadd.f32 %v327_v34, %v319_v33 }
 0x1da   :  { %2641 = vtanh.f32 %v2953_v35  ;;  %337 = vst.msk [vmem:[#allocation4] sm:$0xff] %vm336_vm4, %v2953_v35 }
 0x1e1   :  { %v438_v8 = vld [vmem:[#allocation4] sm:$0xff] }
 0x1e7   :  { %v2642_v36 = vpop.eup %2641 }
 0x1e8   :  { %332 = vrot.lane.b32.xlu1 %v2642_v36, %s2828_s6 }
 0x25a   :  { %v333_v39 = vpop.permute.xlu1 %332 }
 0x25b   :  { %v2967_v41 = vmul.f32 %v2640_v29, %v333_v39  ;;  %v3094_v29 = vpop.f32.mrf.mxu0 }
 0x25d   :  { %339 = vrot.lane.b32.xlu1 %v2967_v41, %s2829_s2  ;;  %v3096_v30 = vpop.f32.mrf.mxu0 }
 0x25f   :  { %v3098_v31 = vpop.f32.mrf.mxu0 }
 0x261   :  { %v3100_v32 = vpop.f32.mrf.mxu0 }
 0x263   :  { %v3102_v33 = vpop.f32.mrf.mxu0 }
 0x265   :  { %v3104_v34 = vpop.f32.mrf.mxu0 }
 0x267   :  { %v3106_v36 = vpop.f32.mrf.mxu0 }
 0x269   :  { %v3108_v39 = vpop.f32.mrf.mxu0 }
 0x2cf   :  { %v340_v47 = vpop.permute.xlu1 %339 }
 0x2d0   :  { %343 = vst.msk [vmem:[#allocation3] sm:$0xff] %vm342_vm5, %v340_v47  ;;  %v3110_v47 = vpop.f32.mrf.mxu0 }
 0x2d7   :  { %v354_v48 = vld [vmem:[#allocation3] sm:$0xff] }
 0x2d8   :  { %356 = vrot.lane.b32.xlu0 %v354_v48, %s2829_s2  ;;  %v3112_v48 = vpop.f32.mrf.mxu0 }
 0x34a   :  { %v357_v49 = vpop.permute.xlu0 %356 }
 0x34b   :  { %2358 = vmatmul.mubr.msk.f32.vlgmr.msra.gmra.mxu1 %vm212_vm1, %v357_v49  ;;  %v154_v49 = vadd.f32 %v153_v25, %v2948_v19 }
 0x34c   :  { %2380 = vmatpush3.msra.mxu1 %v2959_v37  ;;  %2395 = vmatprep.mubr.msk.f32.mxu1 %vm2827_vm2, %v2826_v0 }
 0x34d   :  { %2381 = vmatprep.subr.mxu1 %v2826_v0 }
 0x34e   :  { %2382 = vmatpush3.msra.mxu1 %v2961_v38 }
 0x34f   :  { %2383 = vmatprep.subr.mxu1 %v2826_v0 }
 0x350   :  { %2384 = vmatpush3.msra.mxu1 %v2965_v40 }
 0x351   :  { %2385 = vmatprep.subr.mxu1 %v2826_v0 }
 0x352   :  { %2386 = vmatpush3.msra.mxu1 %v2971_v42 }
 0x353   :  { %2387 = vmatprep.subr.mxu1 %v2826_v0 }
 0x354   :  { %2388 = vmatpush3.msra.mxu1 %v2977_v43 }
 0x355   :  { %2389 = vmatprep.subr.mxu1 %v2826_v0 }
 0x356   :  { %2390 = vmatpush3.msra.mxu1 %v2981_v44 }
 0x357   :  { %2391 = vmatprep.subr.mxu1 %v2826_v0 }
 0x358   :  { %2392 = vmatpush3.msra.mxu1 %v2985_v45 }
 0x359   :  { %2393 = vmatprep.subr.mxu1 %v2826_v0 }
 0x35a   :  { %2394 = vmatpush3.msra.mxu1 %v2989_v46 }
 0x35b   :  { %2417 = vmatprep.subr.mxu1 %v2826_v0 }
 0x40b   :  { %v426_v54 = vpop.f32.mrf.mxu1 }
 0x40c   :  { %v430_v55 = vadd.f32 %v426_v54, %v150_v53 }
 0x40d   :  { %v2359_v56 = vpop.f32.mrf.mxu1 }
 0x40e   :  { %v2149_v57 = vmul.f32 -1.442695, %v430_v55  ;;  %2643 = vtanh.f32 %v430_v55 }
 0x410   :  { %2645 = vpow2.f32 %v2149_v57 }
 0x41b   :  { %v2644_v58 = vpop.eup %2643 }
 0x41c   :  { %445 = vrot.lane.b32.xlu0 %v2644_v58, %s2828_s6 }
 0x41d   :  { %v2646_v59 = vpop.eup %2645 }
 0x41e   :  { %v434_v60 = vadd.f32 1.0, %v2646_v59 }
 0x420   :  { %2647 = vrcp.f32 %v434_v60 }
 0x42d   :  { %v2648_v61 = vpop.eup %2647 }
 0x42e   :  { %440 = vrot.lane.b32.xlu1 %v2648_v61, %s2830_s7 }
 0x48e   :  { %v446_v7 = vpop.permute.xlu0 %445 }
 0x48f   :  { %v448_v15 = vmul.f32 %v2648_v61, %v446_v7 }
 0x4a0   :  { %v441_v14 = vpop.permute.xlu1 %440 }
 0x4a1   :  { %v443_v16 = vmul.f32 %v441_v14, %v438_v8 }
 0x4a3   :  { %v3048_v17 = vadd.f32 %v448_v15, %v443_v16  ;;  %v156_v16 = vadd.f32 %v3088_v26, %v3018_v51 }
 0x4a5   :  { %2649 = vtanh.f32 %v3048_v17  ;;  %456 = vst.msk [vmem:[#allocation4] sm:$0xff] %vm342_vm5, %v3048_v17 }
 0x4b2   :  { %v2650_v21 = vpop.eup %2649 }
 0x4b3   :  { %452 = vrot.lane.b32.xlu1 %v2650_v21, %s2830_s7 }
 0x525   :  { %v453_v22 = vpop.permute.xlu1 %452 }
 0x526   :  { %v3065_v23 = vmul.f32 %v2648_v61, %v453_v22  ;;  %v556_v61 = vld [vmem:[#allocation4] sm:$0xff] }
 0x528   :  { %457 = vst.msk [vmem:[#allocation3] sm:$0xff] %vm352_vm6, %v3065_v23 }
 0x52f   :  { %v474_v24 = vld [vmem:[#allocation3] sm:$0xff] }
 0x530   :  { %2377 = vmatmul.mubr.msk.f32.vlgmr.msra.gmra.mxu0 %vm212_vm1, %v474_v24 }
 0x531   :  { %2399 = vmatpush3.msra.mxu0 %v2870_v1  ;;  %2414 = vmatprep.mubr.msk.f32.mxu0 %vm2827_vm2, %v2826_v0 }
 0x532   :  { %2400 = vmatprep.subr.mxu0 %v2826_v0 }
 0x533   :  { %2401 = vmatpush3.msra.mxu0 %v2872_v2 }
 0x534   :  { %2402 = vmatprep.subr.mxu0 %v2826_v0 }
 0x535   :  { %2403 = vmatpush3.msra.mxu0 %v2882_v5 }
 0x536   :  { %2404 = vmatprep.subr.mxu0 %v2826_v0 }
 0x537   :  { %2405 = vmatpush3.msra.mxu0 %v2895_v9 }
 0x538   :  { %2406 = vmatprep.subr.mxu0 %v2826_v0 }
 0x539   :  { %2407 = vmatpush3.msra.mxu0 %v2899_v10 }
 0x53a   :  { %2408 = vmatprep.subr.mxu0 %v2826_v0 }
 0x53b   :  { %2409 = vmatpush3.msra.mxu0 %v2905_v11 }
 0x53c   :  { %2410 = vmatprep.subr.mxu0 %v2826_v0 }
 0x53d   :  { %2411 = vmatpush3.msra.mxu0 %v2911_v12 }
 0x53e   :  { %2412 = vmatprep.subr.mxu0 %v2826_v0 }
 0x53f   :  { %2413 = vmatpush3.msra.mxu0 %v2917_v13 }
 0x540   :  { %2436 = vmatprep.subr.mxu0 %v2826_v0 }
 0x5f0   :  { %v544_v50 = vpop.f32.mrf.mxu0 }
 0x5f1   :  { %v548_v52 = vadd.f32 %v544_v50, %v154_v49 }
 0x5f2   :  { %v2378_v53 = vpop.f32.mrf.mxu0 }
 0x5f3   :  { %2651 = vtanh.f32 %v548_v52  ;;  %v2151_v55 = vmul.f32 -1.442695, %v548_v52 }
 0x5f5   :  { %2653 = vpow2.f32 %v2151_v55 }
 0x600   :  { %v2652_v54 = vpop.eup %2651 }
 0x601   :  { %559 = vrot.lane.b32.xlu0 %v2652_v54, %s2828_s6 }
 0x602   :  { %v2654_v56 = vpop.eup %2653 }
 0x603   :  { %v552_v57 = vadd.f32 1.0, %v2654_v56 }
 0x605   :  { %2655 = vrcp.f32 %v552_v57 }
 0x612   :  { %v2656_v58 = vpop.eup %2655 }
 0x613   :  { %v557_v62 = vmul.f32 %v2656_v58, %v556_v61  ;;  %v160_v61 = vadd.f32 %v3090_v27, %v2948_v19 }
 0x673   :  { %v560_v59 = vpop.permute.xlu0 %559 }
 0x674   :  { %v562_v60 = vmul.f32 %v2656_v58, %v560_v59 }
 0x676   :  { %564 = vrot.lane.b32.xlu1 %v562_v60, %s2829_s2 }
 0x6e8   :  { %v565_v63 = vpop.permute.xlu1 %564 }
 0x6e9   :  { %v3117_v3 = vadd.f32 %v565_v63, %v557_v62 }
 0x6eb   :  { %2657 = vtanh.f32 %v3117_v3  ;;  %574 = vst.msk [vmem:[#allocation4] sm:$0xff] %vm336_vm4, %v3117_v3 }
 0x6f2   :  { %v674_v53 = vld [vmem:[#allocation4] sm:$0xff] }
 0x6f8   :  { %v2658_v4 = vpop.eup %2657 }
 0x6f9   :  { %570 = vrot.lane.b32.xlu0 %v2658_v4, %s2828_s6 }
 0x76b   :  { %v571_v6 = vpop.permute.xlu0 %570 }
 0x76c   :  { %v3123_v7 = vmul.f32 %v2656_v58, %v571_v6 }
 0x76e   :  { %576 = vrot.lane.b32.xlu1 %v3123_v7, %s2829_s2 }
 0x7e0   :  { %v577_v8 = vpop.permute.xlu1 %576 }
 0x7e1   :  { %579 = vst.msk [vmem:[#allocation3] sm:$0xff] %vm342_vm5, %v577_v8 }
 0x7e8   :  { %v590_v14 = vld [vmem:[#allocation3] sm:$0xff] }
 0x7e9   :  { %592 = vrot.lane.b32.xlu0 %v590_v14, %s2829_s2 }
 0x85b   :  { %v593_v15 = vpop.permute.xlu0 %592 }
 0x85c   :  { %2396 = vmatmul.mubr.msk.f32.vlgmr.msra.gmra.mxu1 %vm212_vm1, %v593_v15 }
 0x85d   :  { %2418 = vmatpush3.msra.mxu1 %v2959_v37  ;;  %2433 = vmatprep.mubr.msk.f32.mxu1 %vm2827_vm2, %v2826_v0 }
 0x85e   :  { %2419 = vmatprep.subr.mxu1 %v2826_v0 }
 0x85f   :  { %2420 = vmatpush3.msra.mxu1 %v2961_v38 }
 0x860   :  { %2421 = vmatprep.subr.mxu1 %v2826_v0 }
 0x861   :  { %2422 = vmatpush3.msra.mxu1 %v2965_v40 }
 0x862   :  { %2423 = vmatprep.subr.mxu1 %v2826_v0 }
 0x863   :  { %2424 = vmatpush3.msra.mxu1 %v2971_v42 }
 0x864   :  { %2425 = vmatprep.subr.mxu1 %v2826_v0 }
 0x865   :  { %2426 = vmatpush3.msra.mxu1 %v2977_v43 }
 0x866   :  { %2427 = vmatprep.subr.mxu1 %v2826_v0 }
 0x867   :  { %2428 = vmatpush3.msra.mxu1 %v2981_v44 }
 0x868   :  { %2429 = vmatprep.subr.mxu1 %v2826_v0 }
 0x869   :  { %2430 = vmatpush3.msra.mxu1 %v2985_v45 }
 0x86a   :  { %2431 = vmatprep.subr.mxu1 %v2826_v0 }
 0x86b   :  { %2432 = vmatpush3.msra.mxu1 %v2989_v46 }
 0x86c   :  { %2455 = vmatprep.subr.mxu1 %v2826_v0 }
 0x91c   :  { %v662_v18 = vpop.f32.mrf.mxu1 }
 0x91d   :  { %v666_v20 = vadd.f32 %v662_v18, %v156_v16 }
 0x91e   :  { %v2397_v21 = vpop.f32.mrf.mxu1 }
 0x91f   :  { %v2153_v22 = vmul.f32 -1.442695, %v666_v20  ;;  %2659 = vtanh.f32 %v666_v20 }
 0x921   :  { %2661 = vpow2.f32 %v2153_v22 }
 0x92c   :  { %v2660_v24 = vpop.eup %2659 }
 0x92d   :  { %681 = vrot.lane.b32.xlu0 %v2660_v24, %s2828_s6 }
 0x92e   :  { %v2662_v25 = vpop.eup %2661 }
 0x92f   :  { %v670_v49 = vadd.f32 1.0, %v2662_v25 }
 0x931   :  { %2663 = vrcp.f32 %v670_v49 }
 0x93e   :  { %v2664_v50 = vpop.eup %2663 }
 0x93f   :  { %676 = vrot.lane.b32.xlu1 %v2664_v50, %s2830_s7 }
 0x99f   :  { %v682_v52 = vpop.permute.xlu0 %681 }
 0x9a0   :  { %v684_v55 = vmul.f32 %v2664_v50, %v682_v52 }
 0x9b1   :  { %v677_v54 = vpop.permute.xlu1 %676 }
 0x9b2   :  { %v679_v26 = vmul.f32 %v677_v54, %v674_v53 }
 0x9b4   :  { %v3152_v56 = vadd.f32 %v684_v55, %v679_v26  ;;  %v162_v55 = vadd.f32 %v3092_v28, %v3018_v51 }
 0x9b6   :  { %2665 = vtanh.f32 %v3152_v56  ;;  %692 = vst.msk [vmem:[#allocation4] sm:$0xff] %vm342_vm5, %v3152_v56 }
 0x9bd   :  { %v791_v21 = vld [vmem:[#allocation4] sm:$0xff] }
 0x9c3   :  { %v2666_v57 = vpop.eup %2665 }
 0x9c4   :  { %688 = vrot.lane.b32.xlu1 %v2666_v57, %s2830_s7 }
 0xa36   :  { %v689_v58 = vpop.permute.xlu1 %688 }
 0xa37   :  { %v3158_v59 = vmul.f32 %v2664_v50, %v689_v58 }
 0xa39   :  { %693 = vst.msk [vmem:[#allocation3] sm:$0xff] %vm352_vm6, %v3158_v59 }
 0xa40   :  { %v709_v60 = vld [vmem:[#allocation3] sm:$0xff] }
 0xa41   :  { %2415 = vmatmul.mubr.msk.f32.vlgmr.msra.gmra.mxu0 %vm212_vm1, %v709_v60 }
 0xa42   :  { %2437 = vmatpush3.msra.mxu0 %v2870_v1  ;;  %2452 = vmatprep.mubr.msk.f32.mxu0 %vm2827_vm2, %v2826_v0 }
 0xa43   :  { %2438 = vmatprep.subr.mxu0 %v2826_v0 }
 0xa44   :  { %2439 = vmatpush3.msra.mxu0 %v2872_v2 }
 0xa45   :  { %2440 = vmatprep.subr.mxu0 %v2826_v0 }
 0xa46   :  { %2441 = vmatpush3.msra.mxu0 %v2882_v5 }
 0xa47   :  { %2442 = vmatprep.subr.mxu0 %v2826_v0 }
 0xa48   :  { %2443 = vmatpush3.msra.mxu0 %v2895_v9 }
 0xa49   :  { %2444 = vmatprep.subr.mxu0 %v2826_v0 }
 0xa4a   :  { %2445 = vmatpush3.msra.mxu0 %v2899_v10 }
 0xa4b   :  { %2446 = vmatprep.subr.mxu0 %v2826_v0 }
 0xa4c   :  { %2447 = vmatpush3.msra.mxu0 %v2905_v11 }
 0xa4d   :  { %2448 = vmatprep.subr.mxu0 %v2826_v0 }
 0xa4e   :  { %2449 = vmatpush3.msra.mxu0 %v2911_v12 }
 0xa4f   :  { %2450 = vmatprep.subr.mxu0 %v2826_v0 }
 0xa50   :  { %2451 = vmatpush3.msra.mxu0 %v2917_v13 }
 0xa51   :  { %2474 = vmatprep.subr.mxu0 %v2826_v0 }
 0xb01   :  { %v779_v62 = vpop.f32.mrf.mxu0 }
 0xb02   :  { %v783_v63 = vadd.f32 %v779_v62, %v160_v61 }
 0xb03   :  { %v2416_v4 = vpop.f32.mrf.mxu0 }
 0xb04   :  { %2667 = vtanh.f32 %v783_v63  ;;  %v2155_v8 = vmul.f32 -1.442695, %v783_v63 }
 0xb06   :  { %2669 = vpow2.f32 %v2155_v8 }
 0xb11   :  { %v2668_v6 = vpop.eup %2667 }
 0xb12   :  { %794 = vrot.lane.b32.xlu0 %v2668_v6, %s2828_s6 }
 0xb13   :  { %v2670_v14 = vpop.eup %2669 }
 0xb14   :  { %v787_v15 = vadd.f32 1.0, %v2670_v14 }
 0xb16   :  { %2671 = vrcp.f32 %v787_v15 }
 0xb23   :  { %v2672_v16 = vpop.eup %2671 }
 0xb24   :  { %v792_v22 = vmul.f32 %v2672_v16, %v791_v21 }
 0xb84   :  { %v795_v18 = vpop.permute.xlu0 %794 }
 0xb85   :  { %v797_v20 = vmul.f32 %v2672_v16, %v795_v18 }
 0xb87   :  { %799 = vrot.lane.b32.xlu1 %v797_v20, %s2829_s2 }
 0xbf9   :  { %v800_v27 = vpop.permute.xlu1 %799 }
 0xbfa   :  { %v3185_v24 = vadd.f32 %v800_v27, %v792_v22  ;;  %v166_v27 = vadd.f32 %v3094_v29, %v2948_v19 }
 0xbfc   :  { %2673 = vtanh.f32 %v3185_v24  ;;  %809 = vst.msk [vmem:[#allocation4] sm:$0xff] %vm336_vm4, %v3185_v24 }
 0xc03   :  { %v909_v8 = vld [vmem:[#allocation4] sm:$0xff] }
 0xc09   :  { %v2674_v25 = vpop.eup %2673 }
 0xc0a   :  { %805 = vrot.lane.b32.xlu0 %v2674_v25, %s2828_s6 }
 0xc7c   :  { %v806_v49 = vpop.permute.xlu0 %805 }
 0xc7d   :  { %v3191_v50 = vmul.f32 %v2672_v16, %v806_v49 }
 0xc7f   :  { %811 = vrot.lane.b32.xlu1 %v3191_v50, %s2829_s2 }
 0xcf1   :  { %v812_v52 = vpop.permute.xlu1 %811 }
 0xcf2   :  { %814 = vst.msk [vmem:[#allocation3] sm:$0xff] %vm342_vm5, %v812_v52 }
 0xcf9   :  { %v825_v53 = vld [vmem:[#allocation3] sm:$0xff] }
 0xcfa   :  { %827 = vrot.lane.b32.xlu0 %v825_v53, %s2829_s2 }
 0xd6c   :  { %v828_v54 = vpop.permute.xlu0 %827 }
 0xd6d   :  { %2434 = vmatmul.mubr.msk.f32.vlgmr.msra.gmra.mxu1 %vm212_vm1, %v828_v54 }
 0xd6e   :  { %2456 = vmatpush3.msra.mxu1 %v2959_v37  ;;  %2471 = vmatprep.mubr.msk.f32.mxu1 %vm2827_vm2, %v2826_v0 }
 0xd6f   :  { %2457 = vmatprep.subr.mxu1 %v2826_v0 }
 0xd70   :  { %2458 = vmatpush3.msra.mxu1 %v2961_v38 }
 0xd71   :  { %2459 = vmatprep.subr.mxu1 %v2826_v0 }
 0xd72   :  { %2460 = vmatpush3.msra.mxu1 %v2965_v40 }
 0xd73   :  { %2461 = vmatprep.subr.mxu1 %v2826_v0 }
 0xd74   :  { %2462 = vmatpush3.msra.mxu1 %v2971_v42 }
 0xd75   :  { %2463 = vmatprep.subr.mxu1 %v2826_v0 }
 0xd76   :  { %2464 = vmatpush3.msra.mxu1 %v2977_v43 }
 0xd77   :  { %2465 = vmatprep.subr.mxu1 %v2826_v0 }
 0xd78   :  { %2466 = vmatpush3.msra.mxu1 %v2981_v44 }
 0xd79   :  { %2467 = vmatprep.subr.mxu1 %v2826_v0 }
 0xd7a   :  { %2468 = vmatpush3.msra.mxu1 %v2985_v45 }
 0xd7b   :  { %2469 = vmatprep.subr.mxu1 %v2826_v0 }
 0xd7c   :  { %2470 = vmatpush3.msra.mxu1 %v2989_v46 }
 0xd7d   :  { %2493 = vmatprep.subr.mxu1 %v2826_v0 }
 0xe2d   :  { %v897_v26 = vpop.f32.mrf.mxu1 }
 0xe2e   :  { %v901_v57 = vadd.f32 %v897_v26, %v162_v55 }
 0xe2f   :  { %v2435_v58 = vpop.f32.mrf.mxu1 }
 0xe30   :  { %v2157_v60 = vmul.f32 -1.442695, %v901_v57  ;;  %2675 = vtanh.f32 %v901_v57 }
 0xe32   :  { %2677 = vpow2.f32 %v2157_v60 }
 0xe3d   :  { %v2676_v61 = vpop.eup %2675 }
 0xe3e   :  { %916 = vrot.lane.b32.xlu0 %v2676_v61, %s2828_s6 }
 0xe3f   :  { %v2678_v62 = vpop.eup %2677 }
 0xe40   :  { %v905_v63 = vadd.f32 1.0, %v2678_v62 }
 0xe42   :  { %2679 = vrcp.f32 %v905_v63 }
 0xe4f   :  { %v2680_v4 = vpop.eup %2679 }
 0xe50   :  { %911 = vrot.lane.b32.xlu1 %v2680_v4, %s2830_s7 }
 0xeb0   :  { %v917_v6 = vpop.permute.xlu0 %916 }
 0xeb1   :  { %v919_v15 = vmul.f32 %v2680_v4, %v917_v6 }
 0xec2   :  { %v912_v14 = vpop.permute.xlu1 %911 }
 0xec3   :  { %v914_v28 = vmul.f32 %v912_v14, %v909_v8 }
 0xec5   :  { %v3220_v16 = vadd.f32 %v919_v15, %v914_v28 }
 0xec7   :  { %2681 = vtanh.f32 %v3220_v16  ;;  %927 = vst.msk [vmem:[#allocation4] sm:$0xff] %vm342_vm5, %v3220_v16 }
 0xece   :  { %v1026_v61 = vld [vmem:[#allocation4] sm:$0xff] }
 0xed4   :  { %v2682_v18 = vpop.eup %2681 }
 0xed5   :  { %923 = vrot.lane.b32.xlu1 %v2682_v18, %s2830_s7  ;;  %v168_v18 = vadd.f32 %v3096_v30, %v3018_v51 }
 0xf47   :  { %v924_v20 = vpop.permute.xlu1 %923 }
 0xf48   :  { %v3226_v21 = vmul.f32 %v2680_v4, %v924_v20 }
 0xf4a   :  { %928 = vst.msk [vmem:[#allocation3] sm:$0xff] %vm352_vm6, %v3226_v21 }
 0xf51   :  { %v944_v22 = vld [vmem:[#allocation3] sm:$0xff] }
 0xf52   :  { %2453 = vmatmul.mubr.msk.f32.vlgmr.msra.gmra.mxu0 %vm212_vm1, %v944_v22 }
 0xf53   :  { %2475 = vmatpush3.msra.mxu0 %v2870_v1  ;;  %2490 = vmatprep.mubr.msk.f32.mxu0 %vm2827_vm2, %v2826_v0 }
 0xf54   :  { %2476 = vmatprep.subr.mxu0 %v2826_v0 }
 0xf55   :  { %2477 = vmatpush3.msra.mxu0 %v2872_v2 }
 0xf56   :  { %2478 = vmatprep.subr.mxu0 %v2826_v0 }
 0xf57   :  { %2479 = vmatpush3.msra.mxu0 %v2882_v5 }
 0xf58   :  { %2480 = vmatprep.subr.mxu0 %v2826_v0 }
 0xf59   :  { %2481 = vmatpush3.msra.mxu0 %v2895_v9 }
 0xf5a   :  { %2482 = vmatprep.subr.mxu0 %v2826_v0 }
 0xf5b   :  { %2483 = vmatpush3.msra.mxu0 %v2899_v10 }
 0xf5c   :  { %2484 = vmatprep.subr.mxu0 %v2826_v0 }
 0xf5d   :  { %2485 = vmatpush3.msra.mxu0 %v2905_v11 }
 0xf5e   :  { %2486 = vmatprep.subr.mxu0 %v2826_v0 }
 0xf5f   :  { %2487 = vmatpush3.msra.mxu0 %v2911_v12 }
 0xf60   :  { %2488 = vmatprep.subr.mxu0 %v2826_v0 }
 0xf61   :  { %2489 = vmatpush3.msra.mxu0 %v2917_v13 }
 0xf62   :  { %2512 = vmatprep.subr.mxu0 %v2826_v0 }
0x1012   :  { %v1014_v25 = vpop.f32.mrf.mxu0 }
0x1013   :  { %v1018_v49 = vadd.f32 %v1014_v25, %v166_v27 }
0x1014   :  { %v2454_v52 = vpop.f32.mrf.mxu0 }
0x1015   :  { %2683 = vtanh.f32 %v1018_v49  ;;  %v2159_v54 = vmul.f32 -1.442695, %v1018_v49 }
0x1017   :  { %2685 = vpow2.f32 %v2159_v54 }
0x1022   :  { %v2684_v53 = vpop.eup %2683 }
0x1023   :  { %1029 = vrot.lane.b32.xlu0 %v2684_v53, %s2828_s6 }
0x1024   :  { %v2686_v55 = vpop.eup %2685 }
0x1025   :  { %v1022_v26 = vadd.f32 1.0, %v2686_v55 }
0x1027   :  { %2687 = vrcp.f32 %v1022_v26 }
0x1034   :  { %v2688_v57 = vpop.eup %2687 }
0x1035   :  { %v1027_v62 = vmul.f32 %v2688_v57, %v1026_v61 }
0x1095   :  { %v1030_v58 = vpop.permute.xlu0 %1029 }
0x1096   :  { %v1032_v60 = vmul.f32 %v2688_v57, %v1030_v58 }
0x1098   :  { %1034 = vrot.lane.b32.xlu1 %v1032_v60, %s2829_s2 }
0x110a   :  { %v1035_v29 = vpop.permute.xlu1 %1034 }
0x110b   :  { %v3253_v63 = vadd.f32 %v1035_v29, %v1027_v62 }
0x110d   :  { %2689 = vtanh.f32 %v3253_v63  ;;  %1044 = vst.msk [vmem:[#allocation4] sm:$0xff] %vm336_vm4, %v3253_v63 }
0x1114   :  { %v1144_v26 = vld [vmem:[#allocation4] sm:$0xff] }
0x111a   :  { %v2690_v4 = vpop.eup %2689 }
0x111b   :  { %1040 = vrot.lane.b32.xlu0 %v2690_v4, %s2828_s6 }
0x118d   :  { %v1041_v6 = vpop.permute.xlu0 %1040 }
0x118e   :  { %v3259_v8 = vmul.f32 %v2688_v57, %v1041_v6 }
0x1190   :  { %1046 = vrot.lane.b32.xlu1 %v3259_v8, %s2829_s2 }
0x1202   :  { %v1047_v14 = vpop.permute.xlu1 %1046 }
0x1203   :  { %1049 = vst.msk [vmem:[#allocation3] sm:$0xff] %vm342_vm5, %v1047_v14 }
0x120a   :  { %v1060_v15 = vld [vmem:[#allocation3] sm:$0xff] }
0x120b   :  { %1062 = vrot.lane.b32.xlu0 %v1060_v15, %s2829_s2 }
0x127d   :  { %v1063_v28 = vpop.permute.xlu0 %1062 }
0x127e   :  { %2472 = vmatmul.mubr.msk.f32.vlgmr.msra.gmra.mxu1 %vm212_vm1, %v1063_v28 }
0x127f   :  { %2494 = vmatpush3.msra.mxu1 %v2959_v37  ;;  %2509 = vmatprep.mubr.msk.f32.mxu1 %vm2827_vm2, %v2826_v0 }
0x1280   :  { %2495 = vmatprep.subr.mxu1 %v2826_v0 }
0x1281   :  { %2496 = vmatpush3.msra.mxu1 %v2961_v38 }
0x1282   :  { %2497 = vmatprep.subr.mxu1 %v2826_v0 }
0x1283   :  { %2498 = vmatpush3.msra.mxu1 %v2965_v40 }
0x1284   :  { %2499 = vmatprep.subr.mxu1 %v2826_v0 }
0x1285   :  { %2500 = vmatpush3.msra.mxu1 %v2971_v42 }
0x1286   :  { %2501 = vmatprep.subr.mxu1 %v2826_v0 }
0x1287   :  { %2502 = vmatpush3.msra.mxu1 %v2977_v43 }
0x1288   :  { %2503 = vmatprep.subr.mxu1 %v2826_v0 }
0x1289   :  { %2504 = vmatpush3.msra.mxu1 %v2981_v44 }
0x128a   :  { %2505 = vmatprep.subr.mxu1 %v2826_v0 }
0x128b   :  { %2506 = vmatpush3.msra.mxu1 %v2985_v45 }
0x128c   :  { %2507 = vmatprep.subr.mxu1 %v2826_v0 }
0x128d   :  { %2508 = vmatpush3.msra.mxu1 %v2989_v46 }
0x128e   :  { %2531 = vmatprep.subr.mxu1 %v2826_v0 }
0x133e   :  { %v1132_v20 = vpop.f32.mrf.mxu1 }
0x133f   :  { %v1136_v22 = vadd.f32 %v1132_v20, %v168_v18 }
0x1340   :  { %v2473_v27 = vpop.f32.mrf.mxu1 }
0x1341   :  { %v2161_v25 = vmul.f32 -1.442695, %v1136_v22  ;;  %2691 = vtanh.f32 %v1136_v22 }
0x1343   :  { %2693 = vpow2.f32 %v2161_v25 }
0x134e   :  { %v2692_v49 = vpop.eup %2691 }
0x134f   :  { %1151 = vrot.lane.b32.xlu0 %v2692_v49, %s2828_s6 }
0x1350   :  { %v2694_v52 = vpop.eup %2693 }
0x1351   :  { %v1140_v53 = vadd.f32 1.0, %v2694_v52 }
0x1353   :  { %2695 = vrcp.f32 %v1140_v53 }
0x1360   :  { %v2696_v54 = vpop.eup %2695 }
0x1361   :  { %1146 = vrot.lane.b32.xlu1 %v2696_v54, %s2830_s7 }
0x13c1   :  { %v1152_v55 = vpop.permute.xlu0 %1151 }
0x13c2   :  { %v1154_v58 = vmul.f32 %v2696_v54, %v1152_v55 }
0x13d3   :  { %v1147_v57 = vpop.permute.xlu1 %1146 }
0x13d4   :  { %v1149_v30 = vmul.f32 %v1147_v57, %v1144_v26 }
0x13d6   :  { %v3288_v60 = vadd.f32 %v1154_v58, %v1149_v30 }
0x13d8   :  { %2697 = vtanh.f32 %v3288_v60  ;;  %1162 = vst.msk [vmem:[#allocation4] sm:$0xff] %vm342_vm5, %v3288_v60 }
0x13df   :  { %v1261_v28 = vld [vmem:[#allocation4] sm:$0xff] }
0x13e5   :  { %v2698_v61 = vpop.eup %2697 }
0x13e6   :  { %1158 = vrot.lane.b32.xlu1 %v2698_v61, %s2830_s7 }
0x1458   :  { %v1159_v62 = vpop.permute.xlu1 %1158 }
0x1459   :  { %v3294_v29 = vmul.f32 %v2696_v54, %v1159_v62 }
0x145b   :  { %1163 = vst.msk [vmem:[#allocation3] sm:$0xff] %vm352_vm6, %v3294_v29 }
0x1462   :  { %v1179_v4 = vld [vmem:[#allocation3] sm:$0xff] }
0x1463   :  { %2491 = vmatmul.mubr.msk.f32.vlgmr.msra.gmra.mxu0 %vm212_vm1, %v1179_v4 }
0x1464   :  { %2513 = vmatpush3.msra.mxu0 %v2870_v1  ;;  %2528 = vmatprep.mubr.msk.f32.mxu0 %vm2827_vm2, %v2826_v0  ;;  %v172_v1 = vadd.f32 %v3098_v31, %v2948_v19 }
0x1465   :  { %2514 = vmatprep.subr.mxu0 %v2826_v0 }
0x1466   :  { %2515 = vmatpush3.msra.mxu0 %v2872_v2 }
0x1467   :  { %2516 = vmatprep.subr.mxu0 %v2826_v0 }
0x1468   :  { %2517 = vmatpush3.msra.mxu0 %v2882_v5 }
0x1469   :  { %2518 = vmatprep.subr.mxu0 %v2826_v0 }
0x146a   :  { %2519 = vmatpush3.msra.mxu0 %v2895_v9 }
0x146b   :  { %2520 = vmatprep.subr.mxu0 %v2826_v0 }
0x146c   :  { %2521 = vmatpush3.msra.mxu0 %v2899_v10 }
0x146d   :  { %2522 = vmatprep.subr.mxu0 %v2826_v0 }
0x146e   :  { %2523 = vmatpush3.msra.mxu0 %v2905_v11 }
0x146f   :  { %2524 = vmatprep.subr.mxu0 %v2826_v0 }
0x1470   :  { %2525 = vmatpush3.msra.mxu0 %v2911_v12 }
0x1471   :  { %2526 = vmatprep.subr.mxu0 %v2826_v0 }
0x1472   :  { %2527 = vmatpush3.msra.mxu0 %v2917_v13 }
0x1473   :  { %2550 = vmatprep.subr.mxu0 %v2826_v0 }
0x1523   :  { %v1249_v2 = vpop.f32.mrf.mxu0 }
0x1524   :  { %v1253_v5 = vadd.f32 %v1249_v2, %v172_v1  ;;  %v3367_v2 = vld [vmem:[#allocation5 + $0x38] sm:$0xff] }
0x1525   :  { %v2492_v9 = vpop.f32.mrf.mxu0 }
0x1526   :  { %2699 = vtanh.f32 %v1253_v5  ;;  %v2163_v11 = vmul.f32 -1.442695, %v1253_v5  ;;  %v3373_v5 = vld [vmem:[#allocation5 + $0x30] sm:$0xff]  ;;  %v3377_v9 = vld [vmem:[#allocation5 + $0x28] sm:$0xff] }
0x1528   :  { %2701 = vpow2.f32 %v2163_v11  ;;  %v3385_v11 = vld [vmem:[#allocation5 + $0x18] sm:$0xff] }
0x1533   :  { %v2700_v10 = vpop.eup %2699 }
0x1534   :  { %1264 = vrot.lane.b32.xlu0 %v2700_v10, %s2828_s6  ;;  %v3381_v10 = vld [vmem:[#allocation5 + $0x20] sm:$0xff] }
0x1535   :  { %v2702_v6 = vpop.eup %2701 }
0x1536   :  { %v1257_v12 = vadd.f32 1.0, %v2702_v6  ;;  %v3389_v6 = vld [vmem:[#allocation5 + $0x10] sm:$0xff] }
0x1538   :  { %2703 = vrcp.f32 %v1257_v12  ;;  %v3393_v12 = vld [vmem:[#allocation5 + $0x8] sm:$0xff] }
0x1545   :  { %v2704_v14 = vpop.eup %2703 }
0x1546   :  { %v1262_v18 = vmul.f32 %v2704_v14, %v1261_v28 }
0x15a6   :  { %v1265_v15 = vpop.permute.xlu0 %1264 }
0x15a7   :  { %v1267_v13 = vmul.f32 %v2704_v14, %v1265_v15  ;;  %v178_v15 = vadd.f32 %v3102_v33, %v2948_v19 }
0x15a9   :  { %1269 = vrot.lane.b32.xlu1 %v1267_v13, %s2829_s2 }
0x161b   :  { %v1270_v31 = vpop.permute.xlu1 %1269 }
0x161c   :  { %v3321_v20 = vadd.f32 %v1270_v31, %v1262_v18 }
0x161e   :  { %2705 = vtanh.f32 %v3321_v20  ;;  %1279 = vst.msk [vmem:[#allocation4] sm:$0xff] %vm336_vm4, %v3321_v20 }
0x1625   :  { %v1379_v26 = vld [vmem:[#allocation4] sm:$0xff] }
0x162b   :  { %v2706_v22 = vpop.eup %2705 }
0x162c   :  { %1275 = vrot.lane.b32.xlu0 %v2706_v22, %s2828_s6 }
0x169e   :  { %v1276_v27 = vpop.permute.xlu0 %1275 }
0x169f   :  { %v3327_v25 = vmul.f32 %v2704_v14, %v1276_v27  ;;  %v3397_v14 = vld [vmem:[#allocation5] sm:$0xff] }
0x16a1   :  { %1281 = vrot.lane.b32.xlu1 %v3327_v25, %s2829_s2 }
0x1713   :  { %v1282_v49 = vpop.permute.xlu1 %1281 }
0x1714   :  { %1284 = vst.msk [vmem:[#allocation3] sm:$0xff] %vm342_vm5, %v1282_v49 }
0x171b   :  { %v1295_v52 = vld [vmem:[#allocation3] sm:$0xff] }
0x171c   :  { %1297 = vrot.lane.b32.xlu0 %v1295_v52, %s2829_s2 }
0x178e   :  { %v1298_v53 = vpop.permute.xlu0 %1297 }
0x178f   :  { %2510 = vmatmul.mubr.msk.f32.vlgmr.msra.gmra.mxu1 %vm212_vm1, %v1298_v53 }
0x1790   :  { %2532 = vmatpush3.msra.mxu1 %v2959_v37  ;;  %2547 = vmatprep.mubr.msk.f32.mxu1 %vm2827_vm2, %v2826_v0  ;;  %v174_v37 = vadd.f32 %v3100_v32, %v3018_v51 }
0x1791   :  { %2533 = vmatprep.subr.mxu1 %v2826_v0 }
0x1792   :  { %2534 = vmatpush3.msra.mxu1 %v2961_v38 }
0x1793   :  { %2535 = vmatprep.subr.mxu1 %v2826_v0 }
0x1794   :  { %2536 = vmatpush3.msra.mxu1 %v2965_v40 }
0x1795   :  { %2537 = vmatprep.subr.mxu1 %v2826_v0 }
0x1796   :  { %2538 = vmatpush3.msra.mxu1 %v2971_v42 }
0x1797   :  { %2539 = vmatprep.subr.mxu1 %v2826_v0 }
0x1798   :  { %2540 = vmatpush3.msra.mxu1 %v2977_v43 }
0x1799   :  { %2541 = vmatprep.subr.mxu1 %v2826_v0 }
0x179a   :  { %2542 = vmatpush3.msra.mxu1 %v2981_v44 }
0x179b   :  { %2543 = vmatprep.subr.mxu1 %v2826_v0 }
0x179c   :  { %2544 = vmatpush3.msra.mxu1 %v2985_v45 }
0x179d   :  { %2545 = vmatprep.subr.mxu1 %v2826_v0 }
0x179e   :  { %2546 = vmatpush3.msra.mxu1 %v2989_v46 }
0x179f   :  { %2569 = vmatprep.subr.mxu1 %v2826_v0 }
0x184f   :  { %v1367_v38 = vpop.f32.mrf.mxu1 }
0x1850   :  { %v1371_v40 = vadd.f32 %v1367_v38, %v174_v37 }
0x1851   :  { %v2511_v42 = vpop.f32.mrf.mxu1 }
0x1852   :  { %v2165_v43 = vmul.f32 -1.442695, %v1371_v40  ;;  %2707 = vtanh.f32 %v1371_v40 }
0x1854   :  { %2709 = vpow2.f32 %v2165_v43 }
0x185f   :  { %v2708_v44 = vpop.eup %2707 }
0x1860   :  { %1386 = vrot.lane.b32.xlu0 %v2708_v44, %s2828_s6 }
0x1861   :  { %v2710_v54 = vpop.eup %2709 }
0x1862   :  { %v1375_v45 = vadd.f32 1.0, %v2710_v54 }
0x1864   :  { %2711 = vrcp.f32 %v1375_v45 }
0x1871   :  { %v2712_v55 = vpop.eup %2711 }
0x1872   :  { %1381 = vrot.lane.b32.xlu1 %v2712_v55, %s2830_s7 }
0x18d2   :  { %v1387_v46 = vpop.permute.xlu0 %1386 }
0x18d3   :  { %v1389_v58 = vmul.f32 %v2712_v55, %v1387_v46 }
0x18e4   :  { %v1382_v57 = vpop.permute.xlu1 %1381 }
0x18e5   :  { %v1384_v32 = vmul.f32 %v1382_v57, %v1379_v26  ;;  %v3418_v26 = vld [vmem:[#allocation5 + $0x78] sm:$0xff]  ;;  %v3424_v57 = vld [vmem:[#allocation5 + $0x70] sm:$0xff] }
0x18e7   :  { %v3356_v30 = vadd.f32 %v1389_v58, %v1384_v32  ;;  %v3428_v58 = vld [vmem:[#allocation5 + $0x68] sm:$0xff]  ;;  %v3432_v32 = vld [vmem:[#allocation5 + $0x60] sm:$0xff] }
0x18e9   :  { %2713 = vtanh.f32 %v3356_v30  ;;  %1397 = vst.msk [vmem:[#allocation4] sm:$0xff] %vm342_vm5, %v3356_v30 }
0x18f0   :  { %v1496_v38 = vld [vmem:[#allocation4] sm:$0xff] }
0x18f6   :  { %v2714_v61 = vpop.eup %2713 }
0x18f7   :  { %1393 = vrot.lane.b32.xlu1 %v2714_v61, %s2830_s7  ;;  %v3436_v61 = vld [vmem:[#allocation5 + $0x58] sm:$0xff] }
0x1969   :  { %v1394_v62 = vpop.permute.xlu1 %1393 }
0x196a   :  { %v3362_v4 = vmul.f32 %v2712_v55, %v1394_v62  ;;  %v3440_v62 = vld [vmem:[#allocation5 + $0x50] sm:$0xff] }
0x196c   :  { %1398 = vst.msk [vmem:[#allocation3] sm:$0xff] %vm352_vm6, %v3362_v4 }
0x1973   :  { %v1414_v1 = vld [vmem:[#allocation3] sm:$0xff] }
0x1974   :  { %2529 = vmatmul.mubr.msk.f32.vlgmr.msra.gmra.mxu0 %vm212_vm1, %v1414_v1  ;;  %v3444_v1 = vld [vmem:[#allocation5 + $0x48] sm:$0xff] }
0x1975   :  { %2551 = vmatpush3.msra.mxu0 %v3367_v2  ;;  %2566 = vmatprep.mubr.msk.f32.mxu0 %vm2827_vm2, %v2826_v0 }
0x1976   :  { %2552 = vmatprep.subr.mxu0 %v2826_v0 }
0x1977   :  { %2553 = vmatpush3.msra.mxu0 %v3373_v5 }
0x1978   :  { %2554 = vmatprep.subr.mxu0 %v2826_v0 }
0x1979   :  { %2555 = vmatpush3.msra.mxu0 %v3377_v9 }
0x197a   :  { %2556 = vmatprep.subr.mxu0 %v2826_v0 }
0x197b   :  { %2557 = vmatpush3.msra.mxu0 %v3381_v10 }
0x197c   :  { %2558 = vmatprep.subr.mxu0 %v2826_v0 }
0x197d   :  { %2559 = vmatpush3.msra.mxu0 %v3385_v11 }
0x197e   :  { %2560 = vmatprep.subr.mxu0 %v2826_v0 }
0x197f   :  { %2561 = vmatpush3.msra.mxu0 %v3389_v6 }
0x1980   :  { %2562 = vmatprep.subr.mxu0 %v2826_v0 }
0x1981   :  { %2563 = vmatpush3.msra.mxu0 %v3393_v12 }
0x1982   :  { %2564 = vmatprep.subr.mxu0 %v2826_v0 }
0x1983   :  { %2565 = vmatpush3.msra.mxu0 %v3397_v14 }
0x1984   :  { %2588 = vmatprep.subr.mxu0 %v2826_v0 }
0x1a34   :  { %v1484_v13 = vpop.f32.mrf.mxu0 }
0x1a35   :  { %v1488_v28 = vadd.f32 %v1484_v13, %v178_v15  ;;  %v3448_v15 = vld [vmem:[#allocation5 + $0x40] sm:$0xff]  ;;  %v180_v13 = vadd.f32 %v3104_v34, %v3018_v51 }
0x1a36   :  { %v2530_v18 = vpop.f32.mrf.mxu0 }
0x1a37   :  { %2715 = vtanh.f32 %v1488_v28  ;;  %v2167_v22 = vmul.f32 -1.442695, %v1488_v28 }
0x1a39   :  { %2717 = vpow2.f32 %v2167_v22 }
0x1a44   :  { %v2716_v31 = vpop.eup %2715 }
0x1a45   :  { %1499 = vrot.lane.b32.xlu0 %v2716_v31, %s2828_s6 }
0x1a46   :  { %v2718_v27 = vpop.eup %2717 }
0x1a47   :  { %v1492_v49 = vadd.f32 1.0, %v2718_v27 }
0x1a49   :  { %2719 = vrcp.f32 %v1492_v49 }
0x1a56   :  { %v2720_v52 = vpop.eup %2719 }
0x1a57   :  { %v1497_v40 = vmul.f32 %v2720_v52, %v1496_v38 }
0x1ab7   :  { %v1500_v53 = vpop.permute.xlu0 %1499 }
0x1ab8   :  { %v1502_v37 = vmul.f32 %v2720_v52, %v1500_v53 }
0x1aba   :  { %1504 = vrot.lane.b32.xlu1 %v1502_v37, %s2829_s2 }
0x1b2c   :  { %v1505_v33 = vpop.permute.xlu1 %1504 }
0x1b2d   :  { %v3405_v42 = vadd.f32 %v1505_v33, %v1497_v40 }
0x1b2f   :  { %2721 = vtanh.f32 %v3405_v42  ;;  %1514 = vst.msk [vmem:[#allocation4] sm:$0xff] %vm336_vm4, %v3405_v42 }
0x1b36   :  { %v1614_v38 = vld [vmem:[#allocation4] sm:$0xff] }
0x1b3c   :  { %v2722_v43 = vpop.eup %2721 }
0x1b3d   :  { %1510 = vrot.lane.b32.xlu0 %v2722_v43, %s2828_s6 }
0x1baf   :  { %v1511_v44 = vpop.permute.xlu0 %1510 }
0x1bb0   :  { %v3411_v54 = vmul.f32 %v2720_v52, %v1511_v44 }
0x1bb2   :  { %1516 = vrot.lane.b32.xlu1 %v3411_v54, %s2829_s2 }
0x1c24   :  { %v1517_v45 = vpop.permute.xlu1 %1516 }
0x1c25   :  { %1519 = vst.msk [vmem:[#allocation3] sm:$0xff] %vm342_vm5, %v1517_v45 }
0x1c2c   :  { %v1530_v55 = vld [vmem:[#allocation3] sm:$0xff] }
0x1c2d   :  { %1532 = vrot.lane.b32.xlu0 %v1530_v55, %s2829_s2 }
0x1c9f   :  { %v1533_v46 = vpop.permute.xlu0 %1532 }
0x1ca0   :  { %2548 = vmatmul.mubr.msk.f32.vlgmr.msra.gmra.mxu1 %vm212_vm1, %v1533_v46 }
0x1ca1   :  { %2570 = vmatpush3.msra.mxu1 %v3418_v26  ;;  %2585 = vmatprep.mubr.msk.f32.mxu1 %vm2827_vm2, %v2826_v0 }
0x1ca2   :  { %2571 = vmatprep.subr.mxu1 %v2826_v0 }
0x1ca3   :  { %2572 = vmatpush3.msra.mxu1 %v3424_v57 }
0x1ca4   :  { %2573 = vmatprep.subr.mxu1 %v2826_v0 }
0x1ca5   :  { %2574 = vmatpush3.msra.mxu1 %v3428_v58 }
0x1ca6   :  { %2575 = vmatprep.subr.mxu1 %v2826_v0 }
0x1ca7   :  { %2576 = vmatpush3.msra.mxu1 %v3432_v32 }
0x1ca8   :  { %2577 = vmatprep.subr.mxu1 %v2826_v0 }
0x1ca9   :  { %2578 = vmatpush3.msra.mxu1 %v3436_v61 }
0x1caa   :  { %2579 = vmatprep.subr.mxu1 %v2826_v0 }
0x1cab   :  { %2580 = vmatpush3.msra.mxu1 %v3440_v62 }
0x1cac   :  { %2581 = vmatprep.subr.mxu1 %v2826_v0 }
0x1cad   :  { %2582 = vmatpush3.msra.mxu1 %v3444_v1 }
0x1cae   :  { %2583 = vmatprep.subr.mxu1 %v2826_v0 }
0x1caf   :  { %2584 = vmatpush3.msra.mxu1 %v3448_v15 }
0x1cb0   :  { %2607 = vmatprep.subr.mxu1 %v2826_v0 }
0x1d60   :  { %v1602_v28 = vpop.f32.mrf.mxu1 }
0x1d61   :  { %v1606_v18 = vadd.f32 %v1602_v28, %v180_v13 }
0x1d62   :  { %v2549_v31 = vpop.f32.mrf.mxu1 }
0x1d63   :  { %v2169_v22 = vmul.f32 -1.442695, %v1606_v18  ;;  %2723 = vtanh.f32 %v1606_v18 }
0x1d65   :  { %2725 = vpow2.f32 %v2169_v22 }
0x1d70   :  { %v2724_v27 = vpop.eup %2723 }
0x1d71   :  { %1621 = vrot.lane.b32.xlu0 %v2724_v27, %s2828_s6 }
0x1d72   :  { %v2726_v49 = vpop.eup %2725 }
0x1d73   :  { %v1610_v52 = vadd.f32 1.0, %v2726_v49 }
0x1d75   :  { %2727 = vrcp.f32 %v1610_v52 }
0x1d82   :  { %v2728_v53 = vpop.eup %2727 }
0x1d83   :  { %1616 = vrot.lane.b32.xlu1 %v2728_v53, %s2830_s7 }
0x1de3   :  { %v1622_v37 = vpop.permute.xlu0 %1621 }
0x1de4   :  { %v1624_v33 = vmul.f32 %v2728_v53, %v1622_v37 }
0x1df5   :  { %v1617_v40 = vpop.permute.xlu1 %1616 }
0x1df6   :  { %v1619_v34 = vmul.f32 %v1617_v40, %v1614_v38 }
0x1df8   :  { %v3456_v43 = vadd.f32 %v1624_v33, %v1619_v34 }
0x1dfa   :  { %2729 = vtanh.f32 %v3456_v43  ;;  %1632 = vst.msk [vmem:[#allocation4] sm:$0xff] %vm342_vm5, %v3456_v43 }
0x1e07   :  { %v2730_v44 = vpop.eup %2729 }
0x1e08   :  { %1628 = vrot.lane.b32.xlu1 %v2730_v44, %s2830_s7 }
0x1e7a   :  { %v1629_v45 = vpop.permute.xlu1 %1628 }
0x1e7b   :  { %v3462_v55 = vmul.f32 %v2728_v53, %v1629_v45 }
0x1e7d   :  { %1633 = vst.msk [vmem:[#allocation3] sm:$0xff] %vm352_vm6, %v3462_v55 }
0x1e84   :  { %v1649_v46 = vld [vmem:[#allocation3] sm:$0xff] }
0x1e85   :  { %2567 = vmatmul.mubr.msk.f32.vlgmr.msra.gmra.mxu0 %vm212_vm1, %v1649_v46 }
0x1e86   :  { %2589 = vmatpush3.msra.mxu0 %v3367_v2  ;;  %2604 = vmatprep.mubr.msk.f32.mxu0 %vm2827_vm2, %v2826_v0  ;;  %v184_v2 = vadd.f32 %v3106_v36, %v2948_v19 }
0x1e87   :  { %2590 = vmatprep.subr.mxu0 %v2826_v0 }
0x1e88   :  { %2591 = vmatpush3.msra.mxu0 %v3373_v5 }
0x1e89   :  { %2592 = vmatprep.subr.mxu0 %v2826_v0 }
0x1e8a   :  { %2593 = vmatpush3.msra.mxu0 %v3377_v9 }
0x1e8b   :  { %2594 = vmatprep.subr.mxu0 %v2826_v0 }
0x1e8c   :  { %2595 = vmatpush3.msra.mxu0 %v3381_v10 }
0x1e8d   :  { %2596 = vmatprep.subr.mxu0 %v2826_v0 }
0x1e8e   :  { %2597 = vmatpush3.msra.mxu0 %v3385_v11 }
0x1e8f   :  { %2598 = vmatprep.subr.mxu0 %v2826_v0 }
0x1e90   :  { %2599 = vmatpush3.msra.mxu0 %v3389_v6 }
0x1e91   :  { %2600 = vmatprep.subr.mxu0 %v2826_v0 }
0x1e92   :  { %2601 = vmatpush3.msra.mxu0 %v3393_v12 }
0x1e93   :  { %2602 = vmatprep.subr.mxu0 %v2826_v0 }
0x1e94   :  { %2603 = vmatpush3.msra.mxu0 %v3397_v14  ;;  %v1731_v14 = vld [vmem:[#allocation4] sm:$0xff] }
0x1f45   :  { %v1719_v5 = vpop.f32.mrf.mxu0 }
0x1f46   :  { %v1723_v9 = vadd.f32 %v1719_v5, %v184_v2 }
0x1f47   :  { %v2568_v10 = vpop.f32.mrf.mxu0 }
0x1f48   :  { %2731 = vtanh.f32 %v1723_v9  ;;  %v2171_v13 = vmul.f32 -1.442695, %v1723_v9 }
0x1f4a   :  { %2733 = vpow2.f32 %v2171_v13 }
0x1f55   :  { %v2732_v11 = vpop.eup %2731 }
0x1f56   :  { %1734 = vrot.lane.b32.xlu0 %v2732_v11, %s2828_s6  ;;  %v190_v11 = vadd.f32 %v3110_v47, %v2948_v19 }
0x1f57   :  { %v2734_v6 = vpop.eup %2733 }
0x1f58   :  { %v1727_v28 = vadd.f32 1.0, %v2734_v6 }
0x1f5a   :  { %2735 = vrcp.f32 %v1727_v28 }
0x1f67   :  { %v2736_v12 = vpop.eup %2735 }
0x1f68   :  { %v1732_v22 = vmul.f32 %v2736_v12, %v1731_v14 }
0x1fc8   :  { %v1735_v18 = vpop.permute.xlu0 %1734 }
0x1fc9   :  { %v1737_v31 = vmul.f32 %v2736_v12, %v1735_v18 }
0x1fcb   :  { %1739 = vrot.lane.b32.xlu1 %v1737_v31, %s2829_s2 }
0x203d   :  { %v1740_v36 = vpop.permute.xlu1 %1739 }
0x203e   :  { %v3488_v27 = vadd.f32 %v1740_v36, %v1732_v22 }
0x2040   :  { %2737 = vtanh.f32 %v3488_v27  ;;  %1749 = vst.msk [vmem:[#allocation4] sm:$0xff] %vm336_vm4, %v3488_v27 }
0x204d   :  { %v2738_v49 = vpop.eup %2737 }
0x204e   :  { %1745 = vrot.lane.b32.xlu0 %v2738_v49, %s2828_s6 }
0x20c0   :  { %v1746_v52 = vpop.permute.xlu0 %1745 }
0x20c1   :  { %v3494_v53 = vmul.f32 %v2736_v12, %v1746_v52 }
0x20c3   :  { %1751 = vrot.lane.b32.xlu1 %v3494_v53, %s2829_s2 }
0x2135   :  { %v1752_v37 = vpop.permute.xlu1 %1751 }
0x2136   :  { %1754 = vst.msk [vmem:[#allocation3] sm:$0xff] %vm342_vm5, %v1752_v37 }
0x213d   :  { %v1765_v38 = vld [vmem:[#allocation3] sm:$0xff] }
0x213e   :  { %1767 = vrot.lane.b32.xlu0 %v1765_v38, %s2829_s2 }
0x21b0   :  { %v1768_v40 = vpop.permute.xlu0 %1767 }
0x21b1   :  { %2586 = vmatmul.mubr.msk.f32.vlgmr.msra.gmra.mxu1 %vm212_vm1, %v1768_v40 }
0x21b2   :  { %2608 = vmatpush3.msra.mxu1 %v3418_v26  ;;  %2623 = vmatprep.mubr.msk.f32.mxu1 %vm2827_vm2, %v2826_v0  ;;  %v186_v26 = vadd.f32 %v3108_v39, %v3018_v51 }
0x21b3   :  { %2609 = vmatprep.subr.mxu1 %v2826_v0 }
0x21b4   :  { %2610 = vmatpush3.msra.mxu1 %v3424_v57 }
0x21b5   :  { %2611 = vmatprep.subr.mxu1 %v2826_v0 }
0x21b6   :  { %2612 = vmatpush3.msra.mxu1 %v3428_v58 }
0x21b7   :  { %2613 = vmatprep.subr.mxu1 %v2826_v0 }
0x21b8   :  { %2614 = vmatpush3.msra.mxu1 %v3432_v32 }
0x21b9   :  { %2615 = vmatprep.subr.mxu1 %v2826_v0 }
0x21ba   :  { %2616 = vmatpush3.msra.mxu1 %v3436_v61 }
0x21bb   :  { %2617 = vmatprep.subr.mxu1 %v2826_v0 }
0x21bc   :  { %2618 = vmatpush3.msra.mxu1 %v3440_v62 }
0x21bd   :  { %2619 = vmatprep.subr.mxu1 %v2826_v0 }
0x21be   :  { %2620 = vmatpush3.msra.mxu1 %v3444_v1 }
0x21bf   :  { %2621 = vmatprep.subr.mxu1 %v2826_v0 }
0x21c0   :  { %2622 = vmatpush3.msra.mxu1 %v3448_v15  ;;  %v1849_v15 = vld [vmem:[#allocation4] sm:$0xff] }
0x2271   :  { %v1837_v57 = vpop.f32.mrf.mxu1 }
0x2272   :  { %v1841_v58 = vadd.f32 %v1837_v57, %v186_v26 }
0x2273   :  { %v2587_v32 = vpop.f32.mrf.mxu1 }
0x2274   :  { %v2173_v33 = vmul.f32 -1.442695, %v1841_v58  ;;  %2739 = vtanh.f32 %v1841_v58 }
0x2276   :  { %2741 = vpow2.f32 %v2173_v33  ;;  %v192_v33 = vadd.f32 %v3112_v48, %v3018_v51 }
0x2281   :  { %v2740_v61 = vpop.eup %2739 }
0x2282   :  { %1856 = vrot.lane.b32.xlu0 %v2740_v61, %s2828_s6 }
0x2283   :  { %v2742_v62 = vpop.eup %2741 }
0x2284   :  { %v1845_v34 = vadd.f32 1.0, %v2742_v62 }
0x2286   :  { %2743 = vrcp.f32 %v1845_v34 }
0x2293   :  { %v2744_v1 = vpop.eup %2743 }
0x2294   :  { %1851 = vrot.lane.b32.xlu1 %v2744_v1, %s2830_s7 }
0x22f4   :  { %v1857_v0 = vpop.permute.xlu0 %1856 }
0x22f5   :  { %v1859_v45 = vmul.f32 %v2744_v1, %v1857_v0 }
0x2306   :  { %v1852_v44 = vpop.permute.xlu1 %1851 }
0x2307   :  { %v1854_v39 = vmul.f32 %v1852_v44, %v1849_v15 }
0x2309   :  { %v3522_v46 = vadd.f32 %v1859_v45, %v1854_v39 }
0x230b   :  { %2745 = vtanh.f32 %v3522_v46  ;;  %1867 = vst.msk [vmem:[#allocation4] sm:$0xff] %vm342_vm5, %v3522_v46 }
0x2312   :  { %v1966_v52 = vld [vmem:[#allocation4] sm:$0xff] }
0x2318   :  { %v2746_v2 = vpop.eup %2745 }
0x2319   :  { %1863 = vrot.lane.b32.xlu1 %v2746_v2, %s2830_s7 }
0x238b   :  { %v1864_v5 = vpop.permute.xlu1 %1863 }
0x238c   :  { %v1866_v9 = vmul.f32 %v2744_v1, %v1864_v5 }
0x238e   :  { %1868 = vst.msk [vmem:[#allocation3] sm:$0xff] %vm352_vm6, %v1866_v9 }
0x2395   :  { %v1884_v10 = vld [vmem:[#allocation3] sm:$0xff] }
0x2396   :  { %2605 = vmatmul.mubr.msk.f32.vlgmr.msra.gmra.mxu0 %vm212_vm1, %v1884_v10 }
0x2456   :  { %v1954_v13 = vpop.f32.mrf.mxu0 }
0x2457   :  { %v1958_v6 = vadd.f32 %v1954_v13, %v190_v11 }
0x2458   :  { %v2606_v28 = vpop.f32.mrf.mxu0 }
0x2459   :  { %2747 = vtanh.f32 %v1958_v6  ;;  %v2175_v18 = vmul.f32 -1.442695, %v1958_v6 }
0x245b   :  { %2749 = vpow2.f32 %v2175_v18 }
0x2466   :  { %v2748_v12 = vpop.eup %2747 }
0x2467   :  { %1969 = vrot.lane.b32.xlu0 %v2748_v12, %s2828_s6 }
0x2468   :  { %v2750_v31 = vpop.eup %2749 }
0x2469   :  { %v1962_v14 = vadd.f32 1.0, %v2750_v31 }
0x246b   :  { %2751 = vrcp.f32 %v1962_v14 }
0x2478   :  { %v2752_v22 = vpop.eup %2751 }
0x2479   :  { %v1967_v37 = vmul.f32 %v2752_v22, %v1966_v52 }
0x24d9   :  { %v1970_v36 = vpop.permute.xlu0 %1969 }
0x24da   :  { %v1972_v49 = vmul.f32 %v2752_v22, %v1970_v36 }
0x24dc   :  { %1974 = vrot.lane.b32.xlu1 %v1972_v49, %s2829_s2 }
0x254e   :  { %v1975_v19 = vpop.permute.xlu1 %1974 }
0x254f   :  { %v3534_v47 = vadd.f32 %v1975_v19, %v1967_v37 }
0x2551   :  { %2753 = vtanh.f32 %v3534_v47  ;;  %1984 = vst.msk [vmem:[#allocation4] sm:$0xff] %vm336_vm4, %v3534_v47 }
0x255e   :  { %v2754_v38 = vpop.eup %2753 }
0x255f   :  { %1980 = vrot.lane.b32.xlu0 %v2754_v38, %s2828_s6 }
0x25d1   :  { %v1981_v40 = vpop.permute.xlu0 %1980 }
0x25d2   :  { %v3540_v26 = vmul.f32 %v2752_v22, %v1981_v40 }
0x25d4   :  { %1986 = vrot.lane.b32.xlu1 %v3540_v26, %s2829_s2 }
0x2646   :  { %v1987_v57 = vpop.permute.xlu1 %1986 }
0x2647   :  { %1989 = vst.msk [vmem:[#allocation3] sm:$0xff] %vm342_vm5, %v1987_v57 }
0x264e   :  { %v2000_v58 = vld [vmem:[#allocation3] sm:$0xff] }
0x264f   :  { %2002 = vrot.lane.b32.xlu0 %v2000_v58, %s2829_s2 }
0x26c1   :  { %v2003_v32 = vpop.permute.xlu0 %2002 }
0x26c2   :  { %2624 = vmatmul.mubr.msk.f32.vlgmr.msra.gmra.mxu1 %vm212_vm1, %v2003_v32 }
0x2782   :  { %v2072_v61 = vpop.f32.mrf.mxu1 }
0x2783   :  { %v2076_v62 = vadd.f32 %v2072_v61, %v192_v33 }
0x2784   :  { %v2625_v34 = vpop.f32.mrf.mxu1 }
0x2785   :  { %v2177_v1 = vmul.f32 -1.442695, %v2076_v62  ;;  %2755 = vtanh.f32 %v2076_v62 }
0x2787   :  { %2757 = vpow2.f32 %v2177_v1 }
0x2792   :  { %v2756_v0 = vpop.eup %2755 }
0x2793   :  { %2091 = vrot.lane.b32.xlu0 %v2756_v0, %s2828_s6 }
0x2794   :  { %v2758_v15 = vpop.eup %2757 }
0x2795   :  { %v2080_v44 = vadd.f32 1.0, %v2758_v15 }
0x2797   :  { %2759 = vrcp.f32 %v2080_v44  ;;  %344 = vrot.lane.b32.xlu0 %v2967_v41, %s2828_s6 }
0x279b   :  { %815 = vrot.lane.b32.xlu0 %v3191_v50, %s2828_s6 }
0x279f   :  { %1285 = vrot.lane.b32.xlu0 %v3327_v25, %s2828_s6 }
0x27a3   :  { %1755 = vrot.lane.b32.xlu0 %v3494_v53, %s2828_s6 }
0x27a4   :  { %v3558_v51 = vpop.eup %2759 }
0x27a5   :  { %2086 = vrot.lane.b32.xlu1 %v3558_v51, %s2830_s7 }
0x27a7   :  { %349 = vrot.lane.b32.xlu0 %v2953_v35, %s2828_s6 }
0x27ab   :  { %821 = vrot.lane.b32.xlu0 %v3185_v24, %s2828_s6  ;;  %v2084_v24 = vld [vmem:[#allocation4] sm:$0xff] }
0x27af   :  { %1291 = vrot.lane.b32.xlu0 %v3321_v20, %s2828_s6 }
0x27b3   :  { %1761 = vrot.lane.b32.xlu0 %v3488_v27, %s2828_s6 }
0x27b7   :  { %459 = vrot.lane.b32.xlu0 %v3065_v23, %s2829_s2 }
0x27bb   :  { %930 = vrot.lane.b32.xlu0 %v3226_v21, %s2829_s2 }
0x27bf   :  { %1400 = vrot.lane.b32.xlu0 %v3362_v4, %s2829_s2 }
0x27c3   :  { %1870 = vrot.lane.b32.xlu0 %v1866_v9, %s2829_s2 }
0x27c7   :  { %464 = vrot.lane.b32.xlu0 %v3048_v17, %s2828_s6 }
0x27cb   :  { %935 = vrot.lane.b32.xlu0 %v3220_v16, %s2828_s6 }
0x27cf   :  { %1405 = vrot.lane.b32.xlu0 %v3356_v30, %s2828_s6 }
0x27d3   :  { %1875 = vrot.lane.b32.xlu0 %v3522_v46, %s2828_s6 }
0x2805   :  { %v2092_v35 = vpop.permute.xlu0 %2091 }
0x2806   :  { %v2094_v16 = vmul.f32 %v3558_v51, %v2092_v35 }
0x2809   :  { %v345_v41 = vpop.permute.xlu0 %344 }
0x280a   :  { %347 = vst.msk [vmem:[#allocation8] sm:$0xff] %vm336_vm4, %v345_v41 }
0x280d   :  { %v816_v23 = vpop.permute.xlu0 %815 }
0x280e   :  { %819 = vst.msk [vmem:[#allocation8 + $0x10] sm:$0xff] %vm336_vm4, %v816_v23 }
0x2811   :  { %v1286_v48 = vpop.permute.xlu0 %1285 }
0x2812   :  { %1289 = vst.msk [vmem:[#allocation8 + $0x20] sm:$0xff] %vm336_vm4, %v1286_v48 }
0x2815   :  { %v1756_v17 = vpop.permute.xlu0 %1755 }
0x2816   :  { %1759 = vst.msk [vmem:[#allocation8 + $0x30] sm:$0xff] %vm336_vm4, %v1756_v17 }
0x2817   :  { %v2087_v50 = vpop.permute.xlu1 %2086 }
0x2818   :  { %v2089_v21 = vmul.f32 %v2087_v50, %v2084_v24 }
0x2819   :  { %v350_v20 = vpop.permute.xlu0 %349 }
0x281a   :  { %v2095_v25 = vadd.f32 %v2094_v16, %v2089_v21  ;;  %353 = vst.msk [vmem:[#allocation8] sm:$0xff] %vm352_vm6, %v350_v20 }
0x281c   :  { %2761 = vtanh.f32 %v2095_v25  ;;  %2102 = vst.msk [vmem:[#allocation4] sm:$0xff] %vm342_vm5, %v2095_v25 }
0x281d   :  { %v822_v30 = vpop.permute.xlu0 %821 }
0x281e   :  { %824 = vst.msk [vmem:[#allocation8 + $0x10] sm:$0xff] %vm352_vm6, %v822_v30 }
0x2821   :  { %v1292_v4 = vpop.permute.xlu0 %1291 }
0x2822   :  { %1294 = vst.msk [vmem:[#allocation8 + $0x20] sm:$0xff] %vm352_vm6, %v1292_v4 }
0x2825   :  { %v1762_v27 = vpop.permute.xlu0 %1761 }
0x2826   :  { %1764 = vst.msk [vmem:[#allocation8 + $0x30] sm:$0xff] %vm352_vm6, %v1762_v27 }
0x2829   :  { %v2762_v53 = vpop.eup %2761  ;;  %v460_v45 = vpop.permute.xlu0 %459 }
0x282a   :  { %462 = vst.msk [vmem:[#allocation8] sm:$0xff] %vm342_vm5, %v460_v45  ;;  %2098 = vrot.lane.b32.xlu1 %v2762_v53, %s2830_s7 }
0x282d   :  { %v931_v39 = vpop.permute.xlu0 %930 }
0x282e   :  { %933 = vst.msk [vmem:[#allocation8 + $0x10] sm:$0xff] %vm342_vm5, %v931_v39  ;;  %580 = vrot.lane.b32.xlu1 %v3123_v7, %s2828_s6 }
0x2831   :  { %v1401_v46 = vpop.permute.xlu0 %1400 }
0x2832   :  { %1403 = vst.msk [vmem:[#allocation8 + $0x20] sm:$0xff] %vm342_vm5, %v1401_v46  ;;  %1050 = vrot.lane.b32.xlu1 %v3259_v8, %s2828_s6 }
0x2835   :  { %v1871_v2 = vpop.permute.xlu0 %1870 }
0x2836   :  { %1873 = vst.msk [vmem:[#allocation8 + $0x30] sm:$0xff] %vm342_vm5, %v1871_v2  ;;  %1520 = vrot.lane.b32.xlu1 %v3411_v54, %s2828_s6 }
0x2839   :  { %v465_v5 = vpop.permute.xlu0 %464 }
0x283a   :  { %468 = vst.msk [vmem:[#allocation8] sm:$0xff] %vm467_vm7, %v465_v5  ;;  %1990 = vrot.lane.b32.xlu1 %v3540_v26, %s2828_s6 }
0x283d   :  { %v936_v7 = vpop.permute.xlu0 %935 }
0x283e   :  { %938 = vst.msk [vmem:[#allocation8 + $0x10] sm:$0xff] %vm467_vm7, %v936_v7  ;;  %586 = vrot.lane.b32.xlu1 %v3117_v3, %s2828_s6 }
0x2841   :  { %v1406_v8 = vpop.permute.xlu0 %1405 }
0x2842   :  { %1408 = vst.msk [vmem:[#allocation8 + $0x20] sm:$0xff] %vm467_vm7, %v1406_v8  ;;  %1056 = vrot.lane.b32.xlu1 %v3253_v63, %s2828_s6 }
0x2845   :  { %v1876_v54 = vpop.permute.xlu0 %1875 }
0x2846   :  { %1878 = vst.msk [vmem:[#allocation8 + $0x30] sm:$0xff] %vm467_vm7, %v1876_v54  ;;  %1526 = vrot.lane.b32.xlu1 %v3405_v42, %s2828_s6 }
0x284a   :  { %1996 = vrot.lane.b32.xlu1 %v3534_v47, %s2828_s6 }
0x284e   :  { %695 = vrot.lane.b32.xlu1 %v3158_v59, %s2829_s2 }
0x2852   :  { %1165 = vrot.lane.b32.xlu1 %v3294_v29, %s2829_s2 }
0x2856   :  { %1635 = vrot.lane.b32.xlu1 %v3462_v55, %s2829_s2 }
0x285a   :  { %700 = vrot.lane.b32.xlu1 %v3152_v56, %s2828_s6 }
0x285e   :  { %1170 = vrot.lane.b32.xlu1 %v3288_v60, %s2828_s6 }
0x2862   :  { %1640 = vrot.lane.b32.xlu1 %v3456_v43, %s2828_s6 }
0x289c   :  { %v2099_v3 = vpop.permute.xlu1 %2098 }
0x289d   :  { %v2101_v63 = vmul.f32 %v3558_v51, %v2099_v3 }
0x289f   :  { %2103 = vst.msk [vmem:[#allocation3] sm:$0xff] %vm352_vm6, %v2101_v63  ;;  %2105 = vrot.lane.b32.xlu1 %v2101_v63, %s2829_s2 }
0x28a0   :  { %v581_v59 = vpop.permute.xlu1 %580 }
0x28a1   :  { %584 = vst.msk [vmem:[#allocation8 + $0x8] sm:$0xff] %vm336_vm4, %v581_v59 }
0x28a3   :  { %2110 = vrot.lane.b32.xlu1 %v2095_v25, %s2828_s6 }
0x28a4   :  { %v1051_v29 = vpop.permute.xlu1 %1050 }
0x28a5   :  { %1054 = vst.msk [vmem:[#allocation8 + $0x18] sm:$0xff] %vm336_vm4, %v1051_v29 }
0x28a8   :  { %v1521_v56 = vpop.permute.xlu1 %1520 }
0x28a9   :  { %1524 = vst.msk [vmem:[#allocation8 + $0x28] sm:$0xff] %vm336_vm4, %v1521_v56 }
0x28ac   :  { %v1991_v60 = vpop.permute.xlu1 %1990 }
0x28ad   :  { %1994 = vst.msk [vmem:[#allocation8 + $0x38] sm:$0xff] %vm336_vm4, %v1991_v60 }
0x28b0   :  { %v587_v42 = vpop.permute.xlu1 %586 }
0x28b1   :  { %589 = vst.msk [vmem:[#allocation8 + $0x8] sm:$0xff] %vm352_vm6, %v587_v42 }
0x28b4   :  { %v1057_v43 = vpop.permute.xlu1 %1056 }
0x28b5   :  { %1059 = vst.msk [vmem:[#allocation8 + $0x18] sm:$0xff] %vm352_vm6, %v1057_v43 }
0x28b8   :  { %v1527_v55 = vpop.permute.xlu1 %1526 }
0x28b9   :  { %1529 = vst.msk [vmem:[#allocation8 + $0x28] sm:$0xff] %vm352_vm6, %v1527_v55 }
0x28bc   :  { %v1997_v9 = vpop.permute.xlu1 %1996 }
0x28bd   :  { %1999 = vst.msk [vmem:[#allocation8 + $0x38] sm:$0xff] %vm352_vm6, %v1997_v9 }
0x28c0   :  { %v696_v10 = vpop.permute.xlu1 %695 }
0x28c1   :  { %698 = vst.msk [vmem:[#allocation8 + $0x8] sm:$0xff] %vm342_vm5, %v696_v10 }
0x28c4   :  { %v1166_v11 = vpop.permute.xlu1 %1165 }
0x28c5   :  { %1168 = vst.msk [vmem:[#allocation8 + $0x18] sm:$0xff] %vm342_vm5, %v1166_v11 }
0x28c8   :  { %v1636_v13 = vpop.permute.xlu1 %1635 }
0x28c9   :  { %1638 = vst.msk [vmem:[#allocation8 + $0x28] sm:$0xff] %vm342_vm5, %v1636_v13 }
0x28cc   :  { %v701_v6 = vpop.permute.xlu1 %700 }
0x28cd   :  { %703 = vst.msk [vmem:[#allocation8 + $0x8] sm:$0xff] %vm467_vm7, %v701_v6 }
0x28d0   :  { %v1171_v28 = vpop.permute.xlu1 %1170 }
0x28d1   :  { %1173 = vst.msk [vmem:[#allocation8 + $0x18] sm:$0xff] %vm467_vm7, %v1171_v28 }
0x28d4   :  { %v1641_v12 = vpop.permute.xlu1 %1640 }
0x28d5   :  { %1643 = vst.msk [vmem:[#allocation8 + $0x28] sm:$0xff] %vm467_vm7, %v1641_v12 }
0x2911   :  { %v2106_v18 = vpop.permute.xlu1 %2105 }
0x2912   :  { %2108 = vst.msk [vmem:[#allocation8 + $0x38] sm:$0xff] %vm342_vm5, %v2106_v18 }
0x2915   :  { %v2111_v31 = vpop.permute.xlu1 %2110 }
0x2916   :  { %2113 = vst.msk [vmem:[#allocation8 + $0x38] sm:$0xff] %vm467_vm7, %v2111_v31 }
0x2917   :  { %2810 = shalt.err (!%p2807_p9)
}
0x2918   :  { %2125 = dma.vmem_to_hbm [thread:$0]  %s2120_s23, 1024, %s3662_s4, [#allocation7], %s2824_s18, %s2824_s18, %s2825_s19  }
0x2919   :  { %2821 = dma.done.wait [#allocation7], 1024  }
0x291a   :  { %2822 = vsyncadd [#allocation7], 4294966272 }
0x291b   :  { %2129 = vsyncpa [#allocation6], 1 }
0x291c   :  { %2130 = vsyncpa [#allocation7], 1 }

</bundles_post_ra>
